<compile_context>
chip_gen: v7x
topology: tpu7x:2x2x1
jax: 0.10.0
libtpu: 0.0.40
codegen_flags: <defaults>
</compile_context>

<pallas_src>
import functools

import jax
import jax.numpy as jnp
from jax.experimental import pallas as pl
from jax.experimental.pallas import tpu as pltpu

_NEG_BIG = -3.0e38   # plain Python float (bf16/f32 representable); NOT a jnp
                     # array, so it is never a captured kernel constant.


def _hardswish(y):
    # PyTorch nn.Hardswish: x * relu6(x + 3) / 6  (Python-float literals only)
    return y * jnp.clip(y + 3.0, 0.0, 6.0) * (1.0 / 6.0)


def _spp_fused_kernel(x_ref, w1t_ref, b1_ref, w2t_ref, b2_ref, o_ref,
                      pbuf, cat_buf, *, H, W):
    """Fused cv1 -> chained 5x5 max-pool x3 -> cv2 for one batch element (NCHW).

    x_ref   : (1, C1, H*W)  input block (channels on sublanes, pixels on lanes)
    w1t_ref : (C_, C1)      cv1 weight^T, BN scale folded in (weight dtype)
    b1_ref  : (C_, 1)       cv1 folded BN bias (f32)
    w2t_ref : (C2, 4*C_)    cv2 weight^T, BN scale folded in (weight dtype)
    b2_ref  : (C2, 1)       cv2 folded BN bias (f32)
    o_ref   : (1, C2, H*W)  output block
    pbuf    : VMEM (C_, H+4, W+4) pool-dtype scratch (-inf padded borders)
    cat_buf : VMEM (4*C_, H*W)    weight-dtype scratch: in-VMEM concat for cv2
    """
    C_ = w1t_ref.shape[0]
    HW = x_ref.shape[2]
    pool_dt = pbuf.dtype

    # ---- cv1: 1x1 conv == channel matmul in (C, H*W) orientation -----------
    y = jnp.dot(w1t_ref[...], x_ref[0].astype(w1t_ref.dtype),
                preferred_element_type=jnp.float32)          # (C_, HW) f32
    y = _hardswish(y + b1_ref[...])

    # Pool in the MXU-input dtype: max commutes with round-to-bf16, so cv2
    # sees bit-identical operands vs. pooling in f32 and casting afterwards.
    y = y.astype(pool_dt)
    cat_buf[0:C_, :] = y.astype(cat_buf.dtype)

    # -inf borders written ONCE; only the HxW centre is rewritten per stage
    # (the column pass never writes back into pbuf, so borders stay clean).
    pbuf[...] = jnp.full(pbuf.shape, _NEG_BIG, pool_dt)

    cur = y.reshape(C_, H, W)
    for stage in range(1, 4):            # chained 5x5 pools == k = 5, 9, 13
        pbuf[:, 2:2 + H, 2:2 + W] = cur
        # pass 1: 5-tap max along H (sublane-shifted reads of the scratch)
        rmax = pbuf[:, 0:H, :]
        for d in range(1, 5):
            rmax = jnp.maximum(rmax, pbuf[:, d:d + H, :])    # (C_, H, W+4)
        # pass 2: 5-tap max along W on the VALUE (lane shifts; no write-back).
        # The W borders of rmax are still -inf, so no masking is needed.
        cur = rmax[:, :, 0:W]
        for d in range(1, 5):
            cur = jnp.maximum(cur, rmax[:, :, d:d + W])      # (C_, H, W)
        cat_buf[stage * C_:(stage + 1) * C_, :] = (
            cur.reshape(C_, HW).astype(cat_buf.dtype))

    # ---- cv2: ONE long-K matmul over the in-VMEM concat (never hits HBM) ---
    acc = jnp.dot(w2t_ref[...], cat_buf[...],
                  preferred_element_type=jnp.float32)        # (C2, HW) f32
    o_ref[0] = _hardswish(acc + b2_ref[...]).astype(o_ref.dtype)


def spp_forward(x_nchw, params):
    """SPP forward. x_nchw: (B, C1, H, W) f32 -> (B, C2, H, W) f32 (NCHW).

    No layout transposes anywhere: the kernel works in (C, H*W) orientation,
    and the wrapper reshapes are minor-dim collapses/splits (free in XLA).
    """
    B, C1, H, W = x_nchw.shape
    w1t, b1 = params["w1t"], params["b1"]
    w2t, b2 = params["w2t"], params["b2"]
    C_ = w1t.shape[0]
    C2 = w2t.shape[0]
    HW = H * W

    wdt = w2t.dtype
    pool_dt = jnp.float32 if wdt == jnp.dtype(jnp.float32) else jnp.bfloat16

    x_flat = x_nchw.reshape(B, C1, HW)            # free (minor-dim collapse)

    # Explicit VMEM budget from the actual residency (2x headroom, 48 MiB cap
    # so it stays inside v7x's 64 MiB physical VMEM).
    wbytes = jnp.dtype(wdt).itemsize
    pbytes = jnp.dtype(pool_dt).itemsize
    need = (
        2 * C1 * HW * 4                                   # x block (dbl-buf)
        + 2 * C2 * HW * 4                                 # out block (dbl-buf)
        + 2 * ((C_ * C1 + C2 * 4 * C_) * wbytes + (C_ + C2) * 4)  # weights
        + C_ * (H + 4) * (W + 4) * pbytes                 # pbuf
        + 4 * C_ * HW * wbytes                            # cat_buf
        + (C_ + C2) * HW * 4                              # y / acc temporaries
        + C_ * H * (W + 4) * pbytes                       # rmax temporary
    )
    vmem_limit = int(min(max(2 * need, 32 * 1024 * 1024), 48 * 1024 * 1024))

    kernel = functools.partial(_spp_fused_kernel, H=H, W=W)

    out = pl.pallas_call(
        kernel,
        out_shape=jax.ShapeDtypeStruct((B, C2, HW), jnp.float32),
        grid_spec=pltpu.PrefetchScalarGridSpec(
            num_scalar_prefetch=0,
            grid=(B,),
            in_specs=[
                pl.BlockSpec((1, C1, HW), lambda b: (b, 0, 0)),
                pl.BlockSpec((C_, C1), lambda b: (0, 0)),       # resident
                pl.BlockSpec((C_, 1), lambda b: (0, 0)),        # resident
                pl.BlockSpec((C2, 4 * C_), lambda b: (0, 0)),   # resident
                pl.BlockSpec((C2, 1), lambda b: (0, 0)),        # resident
            ],
            out_specs=pl.BlockSpec((1, C2, HW), lambda b: (b, 0, 0)),
            scratch_shapes=[
                pltpu.VMEM((C_, H + 4, W + 4), pool_dt),        # padded image
                pltpu.VMEM((4 * C_, HW), wdt),                  # in-VMEM concat
            ],
        ),
        compiler_params=pltpu.CompilerParams(
            dimension_semantics=("parallel",),
            vmem_limit_bytes=vmem_limit,
        ),
    )(x_flat, w1t, b1, w2t, b2)

    return out.reshape(B, C2, H, W)               # free (minor-dim split)


def make_spp_params(key, c1, c2, eps=1e-5, weight_dtype=jnp.bfloat16):
    """Random SPP params with eval-mode BN folded into the conv weights.

    Weights are stored transposed, (c_out, c_in), so the kernel consumes NCHW
    activations without any transpose.  BN fold uses the init-time running
    stats (mean=0, var=1) -> scale = gamma/sqrt(1+eps), bias = beta.
    TODO(synk): for a real checkpoint fold the actual running stats
    (scale = gamma/sqrt(var+eps); bias = beta - mean*scale).
    Pass weight_dtype=jnp.float32 for exact-f32 numerics (v5e path).
    """
    c_ = c1 // 2
    k1, k2, k3, k4, k5, k6 = jax.random.split(key, 6)

    # PyTorch conv weight (cout, cin, 1, 1) stored here as (cout, cin)
    w1 = 0.1 * jax.random.normal(k1, (c_, c1), jnp.float32)
    w2 = 0.1 * jax.random.normal(k2, (c2, 4 * c_), jnp.float32)

    g1 = 1.0 + 0.1 * jax.random.normal(k3, (c_,), jnp.float32)
    b1 = 0.1 * jax.random.normal(k4, (c_,), jnp.float32)
    g2 = 1.0 + 0.1 * jax.random.normal(k5, (c2,), jnp.float32)
    b2 = 0.1 * jax.random.normal(k6, (c2,), jnp.float32)

    s1 = g1 / jnp.sqrt(1.0 + eps)
    s2 = g2 / jnp.sqrt(1.0 + eps)
    return {
        "w1t": (w1 * s1[:, None]).astype(weight_dtype),
        "b1": b1.reshape(c_, 1).astype(jnp.float32),
        "w2t": (w2 * s2[:, None]).astype(weight_dtype),
        "b2": b2.reshape(c2, 1).astype(jnp.float32),
    }


if __name__ == "__main__":
    B, C1, C2, H, W = 2, 4, 8, 16, 16
    key = jax.random.PRNGKey(0)
    kx, kp = jax.random.split(key)
    x = jax.random.normal(kx, (B, C1, H, W), jnp.float32)    # NCHW input
    params = make_spp_params(kp, C1, C2)

    out = spp_forward(x, params)
    jax.block_until_ready(out)
    assert out.shape == (B, C2, H, W), out.shape
    print("KERNEL_OK")
</pallas_src>

<mosaic_0001>
module attributes {stable_mosaic.version = 11 : i64} {
  func.func @_spp_fused_kernel(%arg0: i32, %arg1: memref<1x4x256xf32, #tpu.memory_space<vmem>>, %arg2: memref<2x4xbf16, #tpu.memory_space<vmem>>, %arg3: memref<2x1xf32, #tpu.memory_space<vmem>>, %arg4: memref<8x8xbf16, #tpu.memory_space<vmem>>, %arg5: memref<8x1xf32, #tpu.memory_space<vmem>>, %arg6: memref<1x8x256xf32, #tpu.memory_space<vmem>>, %arg7: memref<2x20x20xbf16, #tpu.memory_space<vmem>>, %arg8: memref<8x256xbf16, #tpu.memory_space<vmem>>) attributes {dimension_semantics = [#tpu.dimension_semantics<parallel>], iteration_bounds = array<i64: 2>, scalar_prefetch = 0 : i64, scratch_operands = 2 : i64, tpu.core_type = #tpu.core_type<tc>, window_params = [{transform_indices = @transform_0, window_bounds = array<i64: 1, 4, 256>}, {pipeline_mode = #tpu.pipeline_mode<synchronous>, transform_indices = @transform_1, window_bounds = array<i64: 2, 4>}, {pipeline_mode = #tpu.pipeline_mode<synchronous>, transform_indices = @transform_2, window_bounds = array<i64: 2, 1>}, {pipeline_mode = #tpu.pipeline_mode<synchronous>, transform_indices = @transform_3, window_bounds = array<i64: 8, 8>}, {pipeline_mode = #tpu.pipeline_mode<synchronous>, transform_indices = @transform_4, window_bounds = array<i64: 8, 1>}, {transform_indices = @transform_5, window_bounds = array<i64: 1, 8, 256>}]} {
    %c0 = arith.constant 0 : index
    %c0_0 = arith.constant 0 : index
    %0 = vector.load %arg2[%c0, %c0_0] : memref<2x4xbf16, #tpu.memory_space<vmem>>, vector<2x4xbf16>
    %c0_1 = arith.constant 0 : index
    %c0_2 = arith.constant 0 : index
    %c0_3 = arith.constant 0 : index
    %1 = vector.load %arg1[%c0_1, %c0_2, %c0_3] : memref<1x4x256xf32, #tpu.memory_space<vmem>>, vector<1x4x256xf32>
    %2 = vector.shape_cast %1 : vector<1x4x256xf32> to vector<4x256xf32>
    %3 = arith.truncf %2 : vector<4x256xf32> to vector<4x256xbf16>
    %cst = arith.constant dense<0.000000e+00> : vector<2x256xf32>
    %4 = tpu.matmul %0, %3, %cst {dimension_numbers = #tpu.dot_dimension_numbers<[1], [0], [0], [1], [0, 0, 1, 1], [], []>} : vector<2x4xbf16>, vector<4x256xbf16>, vector<2x256xf32> -> vector<2x256xf32>
    %c0_4 = arith.constant 0 : index
    %c0_5 = arith.constant 0 : index
    %5 = vector.load %arg3[%c0_4, %c0_5] : memref<2x1xf32, #tpu.memory_space<vmem>>, vector<2x1xf32>
    %6 = vector.broadcast %5 : vector<2x1xf32> to vector<2x256xf32>
    %7 = arith.addf %4, %6 : vector<2x256xf32>
    %cst_6 = arith.constant 3.000000e+00 : f32
    %8 = vector.broadcast %cst_6 : f32 to vector<2x256xf32>
    %9 = arith.addf %7, %8 : vector<2x256xf32>
    %cst_7 = arith.constant 0.000000e+00 : f32
    %cst_8 = arith.constant 6.000000e+00 : f32
    %10 = vector.broadcast %cst_7 : f32 to vector<2x256xf32>
    %11 = arith.maximumf %10, %9 : vector<2x256xf32>
    %12 = vector.broadcast %cst_8 : f32 to vector<2x256xf32>
    %13 = arith.minimumf %12, %11 : vector<2x256xf32>
    %14 = arith.mulf %7, %13 : vector<2x256xf32>
    %cst_9 = arith.constant 0.166666672 : f32
    %15 = vector.broadcast %cst_9 : f32 to vector<2x256xf32>
    %16 = arith.mulf %14, %15 : vector<2x256xf32>
    %17 = arith.truncf %16 : vector<2x256xf32> to vector<2x256xbf16>
    %c0_10 = arith.constant 0 : index
    %c0_11 = arith.constant 0 : index
    %18 = vector.load %arg8[%c0_10, %c0_11] : memref<8x256xbf16, #tpu.memory_space<vmem>>, vector<2x256xbf16>
    tpu.vector_store %arg8[%c0_10, %c0_11], %17 {strides = array<i32>} : memref<8x256xbf16, #tpu.memory_space<vmem>>, vector<2x256xbf16>,
    %cst_12 = arith.constant -3.004060e+38 : bf16
    %19 = vector.broadcast %cst_12 : bf16 to vector<2x20x20xbf16>
    %c0_13 = arith.constant 0 : index
    %c0_14 = arith.constant 0 : index
    %c0_15 = arith.constant 0 : index
    %20 = vector.load %arg7[%c0_13, %c0_14, %c0_15] : memref<2x20x20xbf16, #tpu.memory_space<vmem>>, vector<2x20x20xbf16>
    tpu.vector_store %arg7[%c0_13, %c0_14, %c0_15], %19 {strides = array<i32>} : memref<2x20x20xbf16, #tpu.memory_space<vmem>>, vector<2x20x20xbf16>,
    %21 = vector.shape_cast %17 : vector<2x256xbf16> to vector<2x16x16xbf16>
    %c0_16 = arith.constant 0 : index
    %c2 = arith.constant 2 : index
    %c2_17 = arith.constant 2 : index
    %22 = vector.load %arg7[%c0_16, %c2, %c2_17] : memref<2x20x20xbf16, #tpu.memory_space<vmem>>, vector<2x16x16xbf16>
    tpu.vector_store %arg7[%c0_16, %c2, %c2_17], %21 {strides = array<i32>} : memref<2x20x20xbf16, #tpu.memory_space<vmem>>, vector<2x16x16xbf16>,
    %c0_18 = arith.constant 0 : index
    %c0_19 = arith.constant 0 : index
    %c0_20 = arith.constant 0 : index
    %23 = vector.load %arg7[%c0_18, %c0_19, %c0_20] : memref<2x20x20xbf16, #tpu.memory_space<vmem>>, vector<2x16x20xbf16>
    %c0_21 = arith.constant 0 : index
    %c1 = arith.constant 1 : index
    %c0_22 = arith.constant 0 : index
    %24 = vector.load %arg7[%c0_21, %c1, %c0_22] : memref<2x20x20xbf16, #tpu.memory_space<vmem>>, vector<2x16x20xbf16>
    %25 = arith.maximumf %23, %24 : vector<2x16x20xbf16>
    %c0_23 = arith.constant 0 : index
    %c2_24 = arith.constant 2 : index
    %c0_25 = arith.constant 0 : index
    %26 = vector.load %arg7[%c0_23, %c2_24, %c0_25] : memref<2x20x20xbf16, #tpu.memory_space<vmem>>, vector<2x16x20xbf16>
    %27 = arith.maximumf %25, %26 : vector<2x16x20xbf16>
    %c0_26 = arith.constant 0 : index
    %c3 = arith.constant 3 : index
    %c0_27 = arith.constant 0 : index
    %28 = vector.load %arg7[%c0_26, %c3, %c0_27] : memref<2x20x20xbf16, #tpu.memory_space<vmem>>, vector<2x16x20xbf16>
    %29 = arith.maximumf %27, %28 : vector<2x16x20xbf16>
    %c0_28 = arith.constant 0 : index
    %c4 = arith.constant 4 : index
    %c0_29 = arith.constant 0 : index
    %30 = vector.load %arg7[%c0_28, %c4, %c0_29] : memref<2x20x20xbf16, #tpu.memory_space<vmem>>, vector<2x16x20xbf16>
    %31 = arith.maximumf %29, %30 : vector<2x16x20xbf16>
    %32 = vector.extract_strided_slice %31 {offsets = [0, 0, 0], sizes = [2, 16, 16], strides = [1, 1, 1]} : vector<2x16x20xbf16> to vector<2x16x16xbf16>
    %33 = vector.extract_strided_slice %31 {offsets = [0, 0, 1], sizes = [2, 16, 16], strides = [1, 1, 1]} : vector<2x16x20xbf16> to vector<2x16x16xbf16>
    %34 = arith.maximumf %32, %33 : vector<2x16x16xbf16>
    %35 = vector.extract_strided_slice %31 {offsets = [0, 0, 2], sizes = [2, 16, 16], strides = [1, 1, 1]} : vector<2x16x20xbf16> to vector<2x16x16xbf16>
    %36 = arith.maximumf %34, %35 : vector<2x16x16xbf16>
    %37 = vector.extract_strided_slice %31 {offsets = [0, 0, 3], sizes = [2, 16, 16], strides = [1, 1, 1]} : vector<2x16x20xbf16> to vector<2x16x16xbf16>
    %38 = arith.maximumf %36, %37 : vector<2x16x16xbf16>
    %39 = vector.extract_strided_slice %31 {offsets = [0, 0, 4], sizes = [2, 16, 16], strides = [1, 1, 1]} : vector<2x16x20xbf16> to vector<2x16x16xbf16>
    %40 = arith.maximumf %38, %39 : vector<2x16x16xbf16>
    %41 = vector.shape_cast %40 : vector<2x16x16xbf16> to vector<2x256xbf16>
    %c2_30 = arith.constant 2 : index
    %c0_31 = arith.constant 0 : index
    %42 = vector.load %arg8[%c2_30, %c0_31] : memref<8x256xbf16, #tpu.memory_space<vmem>>, vector<2x256xbf16>
    tpu.vector_store %arg8[%c2_30, %c0_31], %41 {strides = array<i32>} : memref<8x256xbf16, #tpu.memory_space<vmem>>, vector<2x256xbf16>,
    %c0_32 = arith.constant 0 : index
    %c2_33 = arith.constant 2 : index
    %c2_34 = arith.constant 2 : index
    %43 = vector.load %arg7[%c0_32, %c2_33, %c2_34] : memref<2x20x20xbf16, #tpu.memory_space<vmem>>, vector<2x16x16xbf16>
    tpu.vector_store %arg7[%c0_32, %c2_33, %c2_34], %40 {strides = array<i32>} : memref<2x20x20xbf16, #tpu.memory_space<vmem>>, vector<2x16x16xbf16>,
    %c0_35 = arith.constant 0 : index
    %c0_36 = arith.constant 0 : index
    %c0_37 = arith.constant 0 : index
    %44 = vector.load %arg7[%c0_35, %c0_36, %c0_37] : memref<2x20x20xbf16, #tpu.memory_space<vmem>>, vector<2x16x20xbf16>
    %c0_38 = arith.constant 0 : index
    %c1_39 = arith.constant 1 : index
    %c0_40 = arith.constant 0 : index
    %45 = vector.load %arg7[%c0_38, %c1_39, %c0_40] : memref<2x20x20xbf16, #tpu.memory_space<vmem>>, vector<2x16x20xbf16>
    %46 = arith.maximumf %44, %45 : vector<2x16x20xbf16>
    %c0_41 = arith.constant 0 : index
    %c2_42 = arith.constant 2 : index
    %c0_43 = arith.constant 0 : index
    %47 = vector.load %arg7[%c0_41, %c2_42, %c0_43] : memref<2x20x20xbf16, #tpu.memory_space<vmem>>, vector<2x16x20xbf16>
    %48 = arith.maximumf %46, %47 : vector<2x16x20xbf16>
    %c0_44 = arith.constant 0 : index
    %c3_45 = arith.constant 3 : index
    %c0_46 = arith.constant 0 : index
    %49 = vector.load %arg7[%c0_44, %c3_45, %c0_46] : memref<2x20x20xbf16, #tpu.memory_space<vmem>>, vector<2x16x20xbf16>
    %50 = arith.maximumf %48, %49 : vector<2x16x20xbf16>
    %c0_47 = arith.constant 0 : index
    %c4_48 = arith.constant 4 : index
    %c0_49 = arith.constant 0 : index
    %51 = vector.load %arg7[%c0_47, %c4_48, %c0_49] : memref<2x20x20xbf16, #tpu.memory_space<vmem>>, vector<2x16x20xbf16>
    %52 = arith.maximumf %50, %51 : vector<2x16x20xbf16>
    %53 = vector.extract_strided_slice %52 {offsets = [0, 0, 0], sizes = [2, 16, 16], strides = [1, 1, 1]} : vector<2x16x20xbf16> to vector<2x16x16xbf16>
    %54 = vector.extract_strided_slice %52 {offsets = [0, 0, 1], sizes = [2, 16, 16], strides = [1, 1, 1]} : vector<2x16x20xbf16> to vector<2x16x16xbf16>
    %55 = arith.maximumf %53, %54 : vector<2x16x16xbf16>
    %56 = vector.extract_strided_slice %52 {offsets = [0, 0, 2], sizes = [2, 16, 16], strides = [1, 1, 1]} : vector<2x16x20xbf16> to vector<2x16x16xbf16>
    %57 = arith.maximumf %55, %56 : vector<2x16x16xbf16>
    %58 = vector.extract_strided_slice %52 {offsets = [0, 0, 3], sizes = [2, 16, 16], strides = [1, 1, 1]} : vector<2x16x20xbf16> to vector<2x16x16xbf16>
    %59 = arith.maximumf %57, %58 : vector<2x16x16xbf16>
    %60 = vector.extract_strided_slice %52 {offsets = [0, 0, 4], sizes = [2, 16, 16], strides = [1, 1, 1]} : vector<2x16x20xbf16> to vector<2x16x16xbf16>
    %61 = arith.maximumf %59, %60 : vector<2x16x16xbf16>
    %62 = vector.shape_cast %61 : vector<2x16x16xbf16> to vector<2x256xbf16>
    %c4_50 = arith.constant 4 : index
    %c0_51 = arith.constant 0 : index
    %63 = vector.load %arg8[%c4_50, %c0_51] : memref<8x256xbf16, #tpu.memory_space<vmem>>, vector<2x256xbf16>
    tpu.vector_store %arg8[%c4_50, %c0_51], %62 {strides = array<i32>} : memref<8x256xbf16, #tpu.memory_space<vmem>>, vector<2x256xbf16>,
    %c0_52 = arith.constant 0 : index
    %c2_53 = arith.constant 2 : index
    %c2_54 = arith.constant 2 : index
    %64 = vector.load %arg7[%c0_52, %c2_53, %c2_54] : memref<2x20x20xbf16, #tpu.memory_space<vmem>>, vector<2x16x16xbf16>
    tpu.vector_store %arg7[%c0_52, %c2_53, %c2_54], %61 {strides = array<i32>} : memref<2x20x20xbf16, #tpu.memory_space<vmem>>, vector<2x16x16xbf16>,
    %c0_55 = arith.constant 0 : index
    %c0_56 = arith.constant 0 : index
    %c0_57 = arith.constant 0 : index
    %65 = vector.load %arg7[%c0_55, %c0_56, %c0_57] : memref<2x20x20xbf16, #tpu.memory_space<vmem>>, vector<2x16x20xbf16>
    %c0_58 = arith.constant 0 : index
    %c1_59 = arith.constant 1 : index
    %c0_60 = arith.constant 0 : index
    %66 = vector.load %arg7[%c0_58, %c1_59, %c0_60] : memref<2x20x20xbf16, #tpu.memory_space<vmem>>, vector<2x16x20xbf16>
    %67 = arith.maximumf %65, %66 : vector<2x16x20xbf16>
    %c0_61 = arith.constant 0 : index
    %c2_62 = arith.constant 2 : index
    %c0_63 = arith.constant 0 : index
    %68 = vector.load %arg7[%c0_61, %c2_62, %c0_63] : memref<2x20x20xbf16, #tpu.memory_space<vmem>>, vector<2x16x20xbf16>
    %69 = arith.maximumf %67, %68 : vector<2x16x20xbf16>
    %c0_64 = arith.constant 0 : index
    %c3_65 = arith.constant 3 : index
    %c0_66 = arith.constant 0 : index
    %70 = vector.load %arg7[%c0_64, %c3_65, %c0_66] : memref<2x20x20xbf16, #tpu.memory_space<vmem>>, vector<2x16x20xbf16>
    %71 = arith.maximumf %69, %70 : vector<2x16x20xbf16>
    %c0_67 = arith.constant 0 : index
    %c4_68 = arith.constant 4 : index
    %c0_69 = arith.constant 0 : index
    %72 = vector.load %arg7[%c0_67, %c4_68, %c0_69] : memref<2x20x20xbf16, #tpu.memory_space<vmem>>, vector<2x16x20xbf16>
    %73 = arith.maximumf %71, %72 : vector<2x16x20xbf16>
    %74 = vector.extract_strided_slice %73 {offsets = [0, 0, 0], sizes = [2, 16, 16], strides = [1, 1, 1]} : vector<2x16x20xbf16> to vector<2x16x16xbf16>
    %75 = vector.extract_strided_slice %73 {offsets = [0, 0, 1], sizes = [2, 16, 16], strides = [1, 1, 1]} : vector<2x16x20xbf16> to vector<2x16x16xbf16>
    %76 = arith.maximumf %74, %75 : vector<2x16x16xbf16>
    %77 = vector.extract_strided_slice %73 {offsets = [0, 0, 2], sizes = [2, 16, 16], strides = [1, 1, 1]} : vector<2x16x20xbf16> to vector<2x16x16xbf16>
    %78 = arith.maximumf %76, %77 : vector<2x16x16xbf16>
    %79 = vector.extract_strided_slice %73 {offsets = [0, 0, 3], sizes = [2, 16, 16], strides = [1, 1, 1]} : vector<2x16x20xbf16> to vector<2x16x16xbf16>
    %80 = arith.maximumf %78, %79 : vector<2x16x16xbf16>
    %81 = vector.extract_strided_slice %73 {offsets = [0, 0, 4], sizes = [2, 16, 16], strides = [1, 1, 1]} : vector<2x16x20xbf16> to vector<2x16x16xbf16>
    %82 = arith.maximumf %80, %81 : vector<2x16x16xbf16>
    %83 = vector.shape_cast %82 : vector<2x16x16xbf16> to vector<2x256xbf16>
    %c6 = arith.constant 6 : index
    %c0_70 = arith.constant 0 : index
    %84 = vector.load %arg8[%c6, %c0_70] : memref<8x256xbf16, #tpu.memory_space<vmem>>, vector<2x256xbf16>
    tpu.vector_store %arg8[%c6, %c0_70], %83 {strides = array<i32>} : memref<8x256xbf16, #tpu.memory_space<vmem>>, vector<2x256xbf16>,
    %c0_71 = arith.constant 0 : index
    %c0_72 = arith.constant 0 : index
    %85 = vector.load %arg4[%c0_71, %c0_72] : memref<8x8xbf16, #tpu.memory_space<vmem>>, vector<8x8xbf16>
    %c0_73 = arith.constant 0 : index
    %c0_74 = arith.constant 0 : index
    %86 = vector.load %arg8[%c0_73, %c0_74] : memref<8x256xbf16, #tpu.memory_space<vmem>>, vector<8x256xbf16>
    %cst_75 = arith.constant dense<0.000000e+00> : vector<8x256xf32>
    %87 = tpu.matmul %85, %86, %cst_75 {dimension_numbers = #tpu.dot_dimension_numbers<[1], [0], [0], [1], [0, 0, 1, 1], [], []>} : vector<8x8xbf16>, vector<8x256xbf16>, vector<8x256xf32> -> vector<8x256xf32>
    %c0_76 = arith.constant 0 : index
    %c0_77 = arith.constant 0 : index
    %88 = vector.load %arg5[%c0_76, %c0_77] : memref<8x1xf32, #tpu.memory_space<vmem>>, vector<8x1xf32>
    %89 = vector.broadcast %88 : vector<8x1xf32> to vector<8x256xf32>
    %90 = arith.addf %87, %89 : vector<8x256xf32>
    %cst_78 = arith.constant 3.000000e+00 : f32
    %91 = vector.broadcast %cst_78 : f32 to vector<8x256xf32>
    %92 = arith.addf %90, %91 : vector<8x256xf32>
    %cst_79 = arith.constant 0.000000e+00 : f32
    %cst_80 = arith.constant 6.000000e+00 : f32
    %93 = vector.broadcast %cst_79 : f32 to vector<8x256xf32>
    %94 = arith.maximumf %93, %92 : vector<8x256xf32>
    %95 = vector.broadcast %cst_80 : f32 to vector<8x256xf32>
    %96 = arith.minimumf %95, %94 : vector<8x256xf32>
    %97 = arith.mulf %90, %96 : vector<8x256xf32>
    %cst_81 = arith.constant 0.166666672 : f32
    %98 = vector.broadcast %cst_81 : f32 to vector<8x256xf32>
    %99 = arith.mulf %97, %98 : vector<8x256xf32>
    %c0_82 = arith.constant 0 : index
    %c0_83 = arith.constant 0 : index
    %c0_84 = arith.constant 0 : index
    %100 = vector.load %arg6[%c0_82, %c0_83, %c0_84] : memref<1x8x256xf32, #tpu.memory_space<vmem>>, vector<1x8x256xf32>
    %101 = vector.shape_cast %100 : vector<1x8x256xf32> to vector<8x256xf32>
    %102 = vector.shape_cast %99 : vector<8x256xf32> to vector<1x8x256xf32>
    tpu.vector_store %arg6[%c0_82, %c0_83, %c0_84], %102 {strides = array<i32>} : memref<1x8x256xf32, #tpu.memory_space<vmem>>, vector<1x8x256xf32>,
    return
  }
  func.func @transform_0(%arg0: i32) -> (i32, i32, i32) {
    %c0_i32 = arith.constant 0 : i32
    %c0_i32_0 = arith.constant 0 : i32
    %c0_i32_1 = arith.constant 0 : i32
    return %arg0, %c0_i32, %c0_i32_0 : i32, i32, i32
  }
  func.func @transform_1(%arg0: i32) -> (i32, i32) {
    %c0_i32 = arith.constant 0 : i32
    %c0_i32_0 = arith.constant 0 : i32
    %c0_i32_1 = arith.constant 0 : i32
    return %c0_i32, %c0_i32_0 : i32, i32
  }
  func.func @transform_2(%arg0: i32) -> (i32, i32) {
    %c0_i32 = arith.constant 0 : i32
    %c0_i32_0 = arith.constant 0 : i32
    %c0_i32_1 = arith.constant 0 : i32
    return %c0_i32, %c0_i32_0 : i32, i32
  }
  func.func @transform_3(%arg0: i32) -> (i32, i32) {
    %c0_i32 = arith.constant 0 : i32
    %c0_i32_0 = arith.constant 0 : i32
    %c0_i32_1 = arith.constant 0 : i32
    return %c0_i32, %c0_i32_0 : i32, i32
  }
  func.func @transform_4(%arg0: i32) -> (i32, i32) {
    %c0_i32 = arith.constant 0 : i32
    %c0_i32_0 = arith.constant 0 : i32
    %c0_i32_1 = arith.constant 0 : i32
    return %c0_i32, %c0_i32_0 : i32, i32
  }
  func.func @transform_5(%arg0: i32) -> (i32, i32, i32) {
    %c0_i32 = arith.constant 0 : i32
    %c0_i32_0 = arith.constant 0 : i32
    %c0_i32_1 = arith.constant 0 : i32
    return %arg0, %c0_i32, %c0_i32_0 : i32, i32, i32
  }
}

</mosaic_0001>

<bundles_post_ra>
// kernel: tpu_custom_call.1
= control target key start
LH: loop header
LB: loop body
LE: loop exit
PB: predicated region body
PF: predicated region fallthrough
CT: control target
= control target key end

     0   :  { %10 = vsyncpa [#allocation5], 0  ;;  %s3350_s0 = inlined_call_operand.hbm [shape: f32[2,4,256], index: 0, kind: input, shape index: {}]   ;;  %s3351_s1 = inlined_call_operand.vmem [shape: bf16[2,4], index: 1, kind: input, shape index: {}]   ;;  %s3352_s2 = inlined_call_operand.vmem [shape: f32[2,1], index: 2, kind: input, shape index: {}]   ;;  %s3353_s3 = inlined_call_operand.vmem [shape: bf16[8,8], index: 3, kind: input, shape index: {}]   ;;  %s3354_s4 = inlined_call_operand.vmem [shape: f32[8,1], index: 4, kind: input, shape index: {}]   ;;  %s3355_s5 = inlined_call_operand.hbm [shape: f32[2,8,256], index: 5, kind: output, shape index: {}]  }
   0x1   :  { %12 = vsyncpa [#allocation5 + $0x1], 0 }
   0x2   :  { %13 = vsyncpa [#allocation6], 0 }
   0x3   :  { %15 = vsyncpa [#allocation6 + $0x1], 0  ;;  %s2500_s18 = smov 0   ;;  %s2502_s19 = smov 0  }
   0x4   :  { %s2504_s20 = smov 0   ;;  %s2506_s21 = smov 0  }
   0x5 LB: > { %s2521_s22 = sadd.s32 4294967295, %s2450_s21   ;;  %s2178_s23 = sadd.s32 4294967294, %s2450_s21   ;;  %s2450_s21 = sphi %s2506_s21, %s3380_s21   ;;  %s2446_s20 = sphi %s2504_s20, %s3379_s20   ;;  %s2442_s19 = sphi %s2502_s19, %s3378_s19   ;;  %s2438_s18 = sphi %s2500_s18, %s3377_s18  }
   0x6   : > { %s2525_s24 = sadd.s32 1, %s2450_s21   ;;  %s28_s25 = sadd.s32 1, %s2446_s20 }
   0x7   : > { %s25_s26 = ssub.s32 %s2450_s21, %s2525_s24  ;;  %p35_p0 = scmp.ne.s32.totalorder %s2446_s20, %s2442_s19 }
   0x8   : > { %p26_p1 = scmp.eq.s32.totalorder %s25_s26, 0  ;;  %p36_p2 = scmp.eq.s32.totalorder %s2450_s21, 0 }
   0x9   : > { %p41_p3 = scmp.ne.s32.totalorder %s2442_s19, %s2438_s18  ;;  %p42_p4 = scmp.eq.s32.totalorder %s2521_s22, 0 }
   0xa   : > { %s2537_s27 = scalar_select %p26_p1, %s2446_s20, %s28_s25  }
   0xb   : > { %p2539_p5 = por %p36_p2, %p35_p0  ;;  %p2543_p6 = por %p42_p4, %p41_p3 }
   0xc   : > { %p149_p7 = scmp.eq.s32.totalorder %s2521_s22, 1  ;;  %p155_p8 = scmp.eq.s32.totalorder %s2178_s23, 1 }
   0xd   : > { %p2299_p10 = scmp.lt.s32.totalorder %s2450_s21, 2  ;;  %s187_s7 = sand.u32 1, %s2446_s20  }
   0xe   : > { %p2550_p11 = por %p149_p7, %p35_p0  ;;  %p2554_p12 = por %p155_p8, %p41_p3 }
   0xf   : > { %s2260_s8 = sshll.u32 %s2450_s21, 7  ;;  %s2181_s9 = sshll.u32 %s187_s7, 3 }
  0x10   : > { %s3359_s30 = scalar_select %p2550_p11, 1, 0 }
  0x11   : > { %s3360_s6 = scalar_select %p2554_p12, 1, 0 }
  0x12   : > { %s2563_s12 = scalar_lea.hbm %s3350_s0, %s2260_s8  ;;  %s191_s13 = scalar_lea.vmem [#allocation4], %s2181_s9 }
  0x13   : > { %s199_s14 = sshll.u32 %s191_s13, 4  ;;  %p2567_p13 = pnand %p2299_p10, %p2539_p5  ;;  %s2571_s14 = int_to_ptr.vmem [resolvable:$true] %s199_s14 }
  0x14   : > { %s188_s16 = scalar_lea.sflag [#allocation5], %s187_s7  ;;  %s2354_s17 = scalar_lea.hbm %s2563_s12, 128 }
  0x15   : > { %p2355_p2 = scmp.ne.s32.totalorder %s2563_s12, %s2354_s17  ;;  %p2356_p3 = pneg %p2567_p13 }
  0x16   : > { %s2359_s26 = scalar_lea.hbm %s3350_s0, 256  ;;  %p2360_p5 = scmp.lt.u32.totalorder %s2563_s12, %s3350_s0 }
  0x17   : > { %p2357_p4 = pnand %p2356_p3, %p2355_p2  ;;  %p2361_p8 = scmp.lt.u32.totalorder %s2359_s26, %s2354_s17 }
  0x18   : > { %p2363_p9 = scmp.lt.u32.totalorder %s2354_s17, %s2563_s12 }
  0x19   : > { %p2358_p7 = pneg %p2357_p4  ;;  %p2362_p10 = por %p2361_p8, %p2360_p5 }
  0x1b   : > { %p2364_p0 = por %p2363_p9, %p2362_p10 }
  0x1d   : > { %p2365_p1 = pnand %p2364_p0, %p2358_p7 }
  0x1f   : > { %2368 = shalt.err (!%p2365_p1)
}
  0x20   : > { %s2369_s7 = scalar_lea.vmem %s2571_s14, 128  ;;  %s2452_s9 = smov [#allocation4]  }
  0x21   : > { %p2370_p2 = scmp.ne.s32.totalorder %s2571_s14, %s2369_s7  ;;  %s2374_s10 = sshll.u32 %s2452_s9, 4  ;;  %s2375_s10 = int_to_ptr.vmem [resolvable:$false] %s2374_s10 }
  0x22   : > { %s2376_s11 = scalar_lea.vmem %s2375_s10, 256  ;;  %p2377_p11 = scmp.lt.s32.totalorder %s2571_s14, %s2375_s10 }
  0x23   : > { %p2372_p4 = pnand %p2370_p2, %p2356_p3  ;;  %p2378_p5 = scmp.lt.s32.totalorder %s2376_s11, %s2369_s7 }
  0x25   : > { %p2373_p12 = pneg %p2372_p4  ;;  %p2379_p8 = por %p2378_p5, %p2377_p11 }
  0x27   : > { %p2380_p9 = pnand %p2379_p8, %p2373_p12 }
  0x29   : > { %2383 = shalt.err (!%p2380_p9)
}
  0x2a   : > { %2294 = dma.hbm_to_vmem [thread:$0]  (!%p2567_p13), %s2563_s12, 128, %s2571_s14, %s188_s16  }
  0x2b   : > { %p3362_p0 = scmp.lt.s32.totalorder %s2450_s21, 3  ;;  %p3363_p1 = scmp.ge.s32.totalorder %s2450_s21, 1 }
  0x2d   : > { %p205_p3 = pnand %p3363_p1, %p3362_p0 }
  0x2e   : > { %s2605_s13 = sand.u32 (!%p205_p3), 1, %s2442_s19  }
  0x2f   : > { %208 = sbr.rel (%p205_p3) target bundleno = 1707 (0x6ab), region = 40  ;;  %s2185_s17 = sshll.u32 (!%p205_p3), %s2605_s13, 3 }
  0x30   : > { %s211_s23 = scalar_lea.sflag (!%p205_p3), [#allocation5], %s2605_s13  ;;  %s214_s25 = scalar_lea.vmem (!%p205_p3), [#allocation4], %s2185_s17 }
  0x36   : > { %2429 = dma.done.wait (%p2543_p6), %s211_s23, 128  }
  0x37   : > { %2431 = vsyncadd (%p2543_p6), %s211_s23, 4294967168  ;;  %v2453_v0 = vmov 0   ;;  %v244_v1 = vld [vmem:[%s214_s25] sm:$0xff]  ;;  %vm260_vm0 = vcmask 1041408   ;;  %vm256_vm1 = vcmask 31744   ;;  %s2454_s16 = smov 96   ;;  %v381_v37 = vlaneseq }
  0x38   : > { %299 = vmatprep.mubr.bf16.mxu0 %v2453_v0  ;;  %2349 = vset.pattern.permute.xlu0 %v2453_v0  ;;  %v250_v2 = vld [vmem:[%s3352_s2] sm:$0x3]  ;;  %v246_v3 = vcombine.high %v244_v1, %v244_v1  ;;  %v248_v4 = vpack.c.bf16 %v244_v1, %v244_v1  ;;  %s2455_s26 = smov 112   ;;  %s2456_s28 = smov 80   ;;  %vm327_vm2 = vcmask 158720   ;;  %vm330_vm3 = vcmask 156672  }
  0x39   : > { %2072 = vmatprep.mubr.bf16.mxu1 %v2453_v0  ;;  %2350 = vset.pattern.permute.xlu1 %v2453_v0  ;;  %v243_v7 = vld [vmem:[%s3351_s1] sm:$0x1]  ;;  %s2457_s8 = smov 64   ;;  %s2458_s7 = smov 48   ;;  %v2461_v28 = vmov 4284677986  }
  0x3a   : > { %253 = vperm.xlu0 %2349, %v250_v2   ;;  %v249_v5 = vpack.c.bf16 %v246_v3, %v246_v3  ;;  %v262_v6 = vsel %vm260_vm0, %v248_v4, 0  ;;  %s2459_s9 = smov 32   ;;  %s2460_s10 = smov 16   ;;  %328 = vst.msk [vmem:[#allocation2] sm:$0xf] %vm327_vm2, %v2461_v28  ;;  %v382_v41 = vshrl.u32 %v381_v37, 7 }
  0x3b   : > { %329 = vst.msk [vmem:[#allocation2 + $0x4] sm:$0xf] %vm327_vm2, %v2461_v28  ;;  %332 = vst.msk [vmem:[#allocation2 + $0xc] sm:$0xf] %vm327_vm2, %v2461_v28  ;;  %v2462_v35 = vmov 1983009808  }
  0x3c   : > { %2187 = vmatprep.subr.msk.bf16.mxu0 %vm260_vm0, %v249_v5  ;;  %333 = vst.msk [vmem:[#allocation2 + $0x10] sm:$0xf] %vm327_vm2, %v2461_v28  ;;  %v379_v36 = vunpack.c.l.s4 %v2462_v35  ;;  %v2463_v44 = vmov 1934713408   ;;  %vm489_vm4 = vcmask 1040384   ;;  %vm490_vm5 = vcmask 1044484  }
  0x3d   : > { %268 = vmatpush1.bf16.msra.mxu0 %v262_v6  ;;  %v411_v45 = vunpack.c.l.s4 %v2463_v44  ;;  %331 = vst.msk [vmem:[#allocation2 + $0x8] sm:$0x3] %vm330_vm3, %v2461_v28  ;;  %334 = vst.msk [vmem:[#allocation2 + $0x14] sm:$0x3] %vm330_vm3, %v2461_v28  ;;  %s2464_s11 = smov 2   ;;  %vm520_vm7 = vcmask 142353  }
  0x3e   : > { %v380_v40 = vunpack.c.0.s8 %v379_v36  ;;  %vm2655_vm6 = vmor %vm489_vm4, %vm490_vm5  ;;  %vm522_vm8 = vcmask 142352   ;;  %vm524_vm9 = vcmask 139280   ;;  %vm693_vm10 = vcmask 1045508   ;;  %s2465_s17 = smov 127   ;;  %s2466_s23 = smov 126  }
  0x3f   : > { %v412_v53 = vunpack.c.0.s8 %v411_v45  ;;  %vm535_vm11 = vsmask.f32 3328  ;;  %vm536_vm12 = vsmask.f32 7440  ;;  %vm602_vm13 = vcmask 1042432   ;;  %vm2701_vm4 = vmor %vm260_vm0, %vm693_vm10  ;;  %s2467_s25 = smov 125  }
  0x40   : > { %2188 = vmatmul.mubr.msk.bf16.vlgmr.msra.gmra.mrb[0].mxu0 %vm256_vm1, %v243_v7  ;;  %v2639_v48 = vsub.s32 %v380_v40, %v382_v41  ;;  %vm603_vm14 = vcmask 1046532   ;;  %vm629_vm15 = vsmask.f32 2304  ;;  %vm630_vm1 = vsmask.f32 6416  ;;  %vm2688_vm3 = vmor %vm535_vm11, %vm536_vm12  ;;  %s2468_s12 = smov 124  }
  0x41   : > { %v2645_v1 = vsub.s32 %v412_v53, %v382_v41  ;;  %vm2681_vm2 = vmor %vm602_vm13, %vm603_vm14  ;;  %vm967_vm0 = vcmask 130048   ;;  %vm983_vm10 = vcmask 785408   ;;  %vm986_vm11 = vcmask 916480   ;;  %p3374_p11 = scmp.ne.s32.totalorder %s3359_s30, 0 }
  0x42   : > { %vm2711_vm5 = vmor %vm629_vm15, %vm630_vm1  ;;  %vm2033_vm12 = vcmask 1043456   ;;  %vm2029_vm13 = vcmask 64512  }
  0xb9   : > { %v254_v8 = vpop.permute.xlu0 %253 }
 0x113   : > { %v301_v9 = vpop.f32.mrb[0].mxu0 }
 0x114   : > { %v302_v10 = vadd.f32 %v301_v9, %v254_v8  ;;  %v303_v11 = vpop.f32.mrb[1].mxu0 }
 0x115   : > { %v304_v12 = vadd.f32 %v303_v11, %v254_v8  ;;  %v305_v13 = vpop.f32.mrb[2].mxu0 }
 0x116   : > { %v308_v14 = vadd.f32 3.0, %v302_v10  ;;  %v306_v15 = vpop.f32.mrb[3].mxu0 }
 0x117   : > { %v309_v16 = vadd.f32 3.0, %v304_v12 }
 0x118   : > { %v310_v17 = vmax.f32 %v308_v14, 0.0 }
 0x119   : > { %v311_v18 = vmax.f32 %v309_v16, 0.0 }
 0x11a   : > { %v312_v19 = vmin.f32 %v310_v17, 6.0 }
 0x11b   : > { %v313_v20 = vmin.f32 %v311_v18, 6.0 }
 0x11c   : > { %v314_v21 = vmul.f32 %v312_v19, %v302_v10 }
 0x11d   : > { %v315_v22 = vmul.f32 %v313_v20, %v304_v12 }
 0x11e   : > { %v316_v23 = vmul.f32 0.16666667, %v314_v21 }
 0x11f   : > { %v317_v24 = vmul.f32 0.16666667, %v315_v22 }
 0x120   : > { %v318_v25 = vpack.c.bf16 %v316_v23, %v316_v23 }
 0x121   : > { %v2261_v26 = vpack.c.bf16 %v317_v24, %v316_v23  ;;  %v319_v27 = vpack.c.bf16 %v317_v24, %v317_v24 }
 0x122   : > { %338 = vrot.lane.b32.xlu1 %v318_v25, %s2454_s16  ;;  %335 = vrot.lane.b32.xlu0 %v318_v25, %s2455_s26 }
 0x123   : > { %326 = vst [vmem:[#allocation3] sm:$0x11] %v2261_v26 }
 0x126   : > { %341 = vrot.lane.b32.xlu1 %v318_v25, %s2456_s28  ;;  %344 = vrot.lane.b32.xlu0 %v318_v25, %s2457_s8 }
 0x12a   : > { %347 = vrot.lane.b32.xlu1 %v318_v25, %s2458_s7  ;;  %350 = vrot.lane.b32.xlu0 %v318_v25, %s2459_s9 }
 0x12e   : > { %353 = vrot.lane.b32.xlu1 %v318_v25, %s2460_s10  ;;  %356 = vrot.lane.b32.xlu0 %v319_v27, %s2455_s26 }
 0x132   : > { %359 = vrot.lane.b32.xlu1 %v319_v27, %s2454_s16  ;;  %362 = vrot.lane.b32.xlu0 %v319_v27, %s2456_s28 }
 0x136   : > { %365 = vrot.lane.b32.xlu1 %v319_v27, %s2457_s8  ;;  %368 = vrot.lane.b32.xlu0 %v319_v27, %s2458_s7 }
 0x13a   : > { %371 = vrot.lane.b32.xlu1 %v319_v27, %s2459_s9  ;;  %374 = vrot.lane.b32.xlu0 %v319_v27, %s2460_s10 }
 0x194   : > { %v339_v29 = vpop.permute.xlu1 %338  ;;  %v336_v30 = vpop.permute.xlu0 %335 }
 0x198   : > { %v342_v31 = vpop.permute.xlu1 %341  ;;  %v345_v32 = vpop.permute.xlu0 %344 }
 0x199   : > { %v377_v49 = vcombine.low %v318_v25, %v345_v32 }
 0x19b   : > { %v384_v58 = vrot.slane %v377_v49, %v2639_v48 }
 0x19c   : > { %v348_v33 = vpop.permute.xlu1 %347  ;;  %v351_v34 = vpop.permute.xlu0 %350 }
 0x19d   : > { %v385_v46 = vcombine.low %v339_v29, %v351_v34  ;;  %v426_v50 = vcombine.low %v336_v30, %v348_v33 }
 0x19f   : > { %v392_v54 = vrot.slane %v385_v46, %v2639_v48  ;;  %v433_v59 = vrot.slane %v426_v50, %v2639_v48 }
 0x1a0   : > { %v354_v38 = vpop.permute.xlu1 %353  ;;  %v357_v39 = vpop.permute.xlu0 %356 }
 0x1a1   : > { %v434_v47 = vcombine.low %v342_v31, %v354_v38  ;;  %v409_v2 = vcombine.low %v384_v58, %v392_v54 }
 0x1a3   : > { %v441_v55 = vrot.slane %v434_v47, %v2639_v48  ;;  %v416_v10 = vrot.slane %v409_v2, %v2645_v1 }
 0x1a4   : > { %v360_v42 = vpop.permute.xlu1 %359  ;;  %v363_v43 = vpop.permute.xlu0 %362 }
 0x1a5   : > { %v458_v3 = vcombine.low %v433_v59, %v441_v55 }
 0x1a7   : > { %v465_v11 = vrot.slane %v458_v3, %v2645_v1 }
 0x1a8   : > { %v366_v51 = vpop.permute.xlu1 %365  ;;  %v369_v52 = vpop.permute.xlu0 %368 }
 0x1a9   : > { %v393_v56 = vcombine.low %v319_v27, %v366_v51  ;;  %v442_v57 = vcombine.low %v357_v39, %v369_v52 }
 0x1ab   : > { %v400_v4 = vrot.slane %v393_v56, %v2639_v48  ;;  %v449_v5 = vrot.slane %v442_v57, %v2639_v48 }
 0x1ac   : > { %v372_v60 = vpop.permute.xlu1 %371  ;;  %v375_v61 = vpop.permute.xlu0 %374 }
 0x1ad   : > { %v401_v62 = vcombine.low %v360_v42, %v372_v60  ;;  %v450_v63 = vcombine.low %v363_v43, %v375_v61 }
 0x1af   : > { %v408_v6 = vrot.slane %v401_v62, %v2639_v48  ;;  %v457_v7 = vrot.slane %v450_v63, %v2639_v48 }
 0x1b1   : > { %v417_v8 = vcombine.low %v400_v4, %v408_v6  ;;  %v466_v9 = vcombine.low %v449_v5, %v457_v7 }
 0x1b3   : > { %v424_v12 = vrot.slane %v417_v8, %v2645_v1  ;;  %v473_v13 = vrot.slane %v466_v9, %v2645_v1 }
 0x1b5   : > { %v425_v14 = vcombine.low %v416_v10, %v424_v12  ;;  %v474_v15 = vcombine.low %v465_v11, %v473_v13 }
 0x1b7   : > { %v477_v16 = vpack.i.b16 %v474_v15, %v425_v14  ;;  %v478_v17 = vshrl.u32 %v425_v14, 16  ;;  %v479_v18 = vshrl.u32 %v474_v15, 16 }
 0x1b9   : > { %v2190_v19 = vcombine.low %v477_v16, %v477_v16  ;;  %v480_v20 = vpack.i.b16 %v479_v18, %v478_v17  ;;  %v2191_v21 = vcombine.high %v477_v16, %v477_v16 }
 0x1bb   : > { %v492_v22 = vrot.slane %v2190_v19, 7  ;;  %v2192_v23 = vcombine.low %v480_v20, %v480_v20  ;;  %v2193_v24 = vcombine.high %v480_v20, %v480_v20  ;;  %v494_v29 = vrot.slane %v2191_v21, 7 }
 0x1bd   : > { %502 = vrot.lane.b32.xlu1 %v492_v22, %s2464_s11  ;;  %v493_v26 = vrot.slane %v492_v22, 4  ;;  %v497_v27 = vrot.slane %v2192_v23, 7  ;;  %v499_v31 = vrot.slane %v2193_v24, 7  ;;  %v496_v33 = vrot.slane %v494_v29, 4 }
 0x1bf   : > { %508 = vrot.lane.b32.xlu0 %v497_v27, %s2464_s11  ;;  %v498_v28 = vrot.slane %v497_v27, 4  ;;  %v495_v30 = vsel %vm2655_vm6, %v493_v26, %v494_v29  ;;  %v501_v34 = vrot.slane %v499_v31, 4 }
 0x1c1   : > { %504 = vrot.lane.b32.xlu1 %v495_v30, %s2464_s11  ;;  %v500_v32 = vsel %vm2655_vm6, %v498_v28, %v499_v31 }
 0x1c3   : > { %510 = vrot.lane.b32.xlu0 %v500_v32, %s2464_s11 }
 0x1c5   : > { %506 = vrot.lane.b32.xlu1 %v496_v33, %s2464_s11 }
 0x1c7   : > { %512 = vrot.lane.b32.xlu0 %v501_v34, %s2464_s11 }
 0x22f   : > { %v503_v35 = vpop.permute.xlu1 %502 }
 0x230   : > { %521 = vst.msk [vmem:[#allocation2] sm:$0xe] %vm520_vm7, %v503_v35 }
 0x231   : > { %v509_v36 = vpop.permute.xlu0 %508 }
 0x232   : > { %526 = vst.msk [vmem:[#allocation2 + $0xc] sm:$0xe] %vm520_vm7, %v509_v36 }
 0x233   : > { %v505_v37 = vpop.permute.xlu1 %504 }
 0x234   : > { %523 = vst.msk [vmem:[#allocation2 + $0x4] sm:$0xf] %vm522_vm8, %v505_v37 }
 0x235   : > { %v511_v38 = vpop.permute.xlu0 %510 }
 0x236   : > { %527 = vst.msk [vmem:[#allocation2 + $0x10] sm:$0xf] %vm522_vm8, %v511_v38 }
 0x237   : > { %v507_v39 = vpop.permute.xlu1 %506  ;;  %v529_v40 = vld [vmem:[#allocation2] sm:$0xf] }
 0x238   : > { %v594_v41 = vld [vmem:[#allocation2] sm:$0xe]  ;;  %525 = vst.msk [vmem:[#allocation2 + $0x8] sm:$0x1] %vm524_vm9, %v507_v39  ;;  %v539_v42 = vshrl.u32 %v529_v40, 16  ;;  %v542_v43 = vshll.u32 %v529_v40, 16 }
 0x239   : > { %v633_v44 = vshrl.u32 %v594_v41, 16  ;;  %v513_v45 = vpop.permute.xlu0 %512  ;;  %v2194_v46 = vrot.slane %v594_v41, 9  ;;  %v636_v47 = vshll.u32 %v594_v41, 16  ;;  %v531_v49 = vld [vmem:[#allocation2 + $0xc] sm:$0xf] }
 0x23a   : > { %528 = vst.msk [vmem:[#allocation2 + $0x14] sm:$0x1] %vm524_vm9, %v513_v45  ;;  %v541_v50 = vrot.slane %v539_v42, 4  ;;  %v544_v51 = vrot.slane %v542_v43, 5  ;;  %v686_v53 = vld [vmem:[#allocation2] sm:$0xc] }
 0x23b   : > { %v635_v52 = vrot.slane %v633_v44, 5  ;;  %v563_v54 = vshrl.u32 %v531_v49, 16  ;;  %v2675_v55 = vld [vmem:[#allocation2 + $0x4] sm:$0xf]  ;;  %v638_v56 = vrot.slane %v636_v47, 6  ;;  %v566_v57 = vshll.u32 %v531_v49, 16 }
 0x23c   : > { %v595_v58 = vld [vmem:[#allocation2 + $0xc] sm:$0xe]  ;;  %v545_v59 = vor.u32 %v544_v51, %v541_v50  ;;  %v548_v60 = vshll.u32 %v2675_v55, 16  ;;  %v552_v61 = vshrl.u32 %v2675_v55, 16  ;;  %v607_v63 = vrot.slane %v2675_v55, 5 }
 0x23d   : > { %v639_v3 = vor.u32 %v638_v56, %v635_v52  ;;  %v2196_v4 = vrot.slane %v686_v53, 10  ;;  %v2692_v5 = vld [vmem:[#allocation2 + $0x10] sm:$0xf]  ;;  %v565_v6 = vrot.slane %v563_v54, 4  ;;  %v568_v7 = vrot.slane %v566_v57, 5 }
 0x23e   : > { %v546_v8 = vrot.slane %v545_v59, 4  ;;  %v550_v9 = vrot.slane %v548_v60, 5  ;;  %v697_v10 = vrot.slane %v2675_v55, 6  ;;  %v656_v11 = vshrl.u32 %v595_v58, 16  ;;  %v687_v47 = vld [vmem:[#allocation2 + $0xc] sm:$0xc] }
 0x23f   : > { %v554_v12 = vrot.slane %v552_v61, 4  ;;  %v608_v13 = vsel %vm2681_vm2, %v2194_v46, %v607_v63  ;;  %v641_v14 = vrot.slane %v552_v61, 5  ;;  %v642_v15 = vrot.slane %v548_v60, 6  ;;  %v533_v35 = vld [vmem:[#allocation2 + $0x8] sm:$0x1] }
 0x240   : > { %v551_v17 = vsel %vm2688_vm3, %v546_v8, %v550_v9  ;;  %v569_v18 = vor.u32 %v568_v7, %v565_v6  ;;  %v572_v19 = vshll.u32 %v2692_v5, 16  ;;  %v576_v20 = vshrl.u32 %v2692_v5, 16  ;;  %v627_v51 = vld [vmem:[#allocation2 + $0x8] sm:$0x3] }
 0x241   : > { %v590_v21 = vmax.bf16 %v551_v17, %v529_v40  ;;  %v640_v23 = vrot.slane %v639_v3, 4  ;;  %v2715_v24 = vor.u32 %v642_v15, %v641_v14  ;;  %v614_v26 = vrot.slane %v2692_v5, 5  ;;  %v534_v3 = vld [vmem:[#allocation2 + $0x14] sm:$0x1] }
 0x242   : > { %v570_v27 = vrot.slane %v569_v18, 4  ;;  %v574_v29 = vrot.slane %v572_v19, 5  ;;  %v658_v28 = vrot.slane %v656_v11, 5  ;;  %v659_v30 = vshll.u32 %v595_v58, 16  ;;  %v628_v14 = vld [vmem:[#allocation2 + $0x14] sm:$0x3] }
 0x243   : > { %v623_v31 = vmax.bf16 %v608_v13, %v590_v21  ;;  %v698_v32 = vsel %vm2701_vm4, %v2196_v4, %v697_v10  ;;  %v2195_v33 = vrot.slane %v595_v58, 9  ;;  %v664_v34 = vrot.slane %v576_v20, 5 }
 0x244   : > { %v644_v36 = vsel %vm2711_vm5, %v640_v23, %v2715_v24  ;;  %v575_v37 = vsel %vm2688_vm3, %v570_v27, %v574_v29  ;;  %v661_v38 = vrot.slane %v659_v30, 6  ;;  %v665_v39 = vrot.slane %v572_v19, 6 }
 0x245   : > { %v682_v40 = vmax.bf16 %v644_v36, %v623_v31  ;;  %v578_v41 = vrot.slane %v576_v20, 4  ;;  %v592_v42 = vmax.bf16 %v575_v37, %v531_v49  ;;  %v555_v43 = vor.u32 %v554_v12, %v550_v9 }
 0x246   : > { %v615_v44 = vsel %vm2681_vm2, %v2195_v33, %v614_v26  ;;  %v662_v45 = vor.u32 %v661_v38, %v658_v28  ;;  %v2731_v46 = vor.u32 %v665_v39, %v664_v34  ;;  %v558_v50 = vshll.u32 %v533_v35, 16 }
 0x247   : > { %v2733_v52 = vmax.bf16 %v698_v32, %v682_v40  ;;  %v625_v53 = vmax.bf16 %v615_v44, %v592_v42  ;;  %v556_v54 = vrot.slane %v555_v43, 4  ;;  %v704_v57 = vrot.slane %v2692_v5, 6 }
 0x248   : > { %v663_v56 = vrot.slane %v662_v45, 4  ;;  %v560_v49 = vrot.slane %v558_v50, 5  ;;  %v2197_v58 = vrot.slane %v687_v47, 10  ;;  %v610_v59 = vrot.slane %v533_v35, 5 }
 0x249   : > { %721 = vrot.lane.b32.xlu1 %v2733_v52, %s2465_s17  ;;  %v647_v60 = vshrl.u32 %v627_v51, 16  ;;  %v650_v61 = vshll.u32 %v627_v51, 16  ;;  %v609_v7 = vrot.slane %v607_v63, 4  ;;  %v579_v8 = vor.u32 %v578_v41, %v574_v29 }
 0x24a   : > { %v667_v4 = vsel %vm2711_vm5, %v663_v56, %v2731_v46  ;;  %v561_v6 = vsel %vm2688_vm3, %v556_v54, %v560_v49  ;;  %v705_v15 = vsel %vm2701_vm4, %v2197_v58, %v704_v57  ;;  %v582_v18 = vshll.u32 %v534_v3, 16 }
 0x24b   : > { %v684_v9 = vmax.bf16 %v667_v4, %v625_v53  ;;  %v591_v11 = vmax.bf16 %v561_v6, %v2675_v55  ;;  %v649_v12 = vrot.slane %v647_v60, 5  ;;  %v652_v13 = vrot.slane %v650_v61, 6 }
 0x24c   : > { %v580_v17 = vrot.slane %v579_v8, 4  ;;  %v611_v63 = vsel %vm2681_vm2, %v609_v7, %v610_v59  ;;  %v584_v21 = vrot.slane %v582_v18, 5  ;;  %v670_v23 = vshrl.u32 %v628_v14, 16 }
 0x24d   : > { %v715_v19 = vmax.bf16 %v705_v15, %v684_v9  ;;  %737 = vrot.lane.b32.xlu1 %v2733_v52, %s2466_s23  ;;  %v653_v20 = vor.u32 %v652_v13, %v649_v12  ;;  %v673_v27 = vshll.u32 %v628_v14, 16  ;;  %v624_v29 = vmax.bf16 %v611_v63, %v591_v11 }
 0x24e   : > { %v645_v28 = vrot.slane %v2715_v24, 4  ;;  %v585_v30 = vsel %vm2688_vm3, %v580_v17, %v584_v21  ;;  %v617_v31 = vrot.slane %v534_v3, 5  ;;  %v672_v32 = vrot.slane %v670_v23, 5 }
 0x24f   : > { %725 = vrot.lane.b32.xlu0 %v715_v19, %s2465_s17  ;;  %v675_v33 = vrot.slane %v673_v27, 6  ;;  %v593_v34 = vmax.bf16 %v585_v30, %v2692_v5  ;;  %v700_v36 = vrot.slane %v627_v51, 6  ;;  %v616_v37 = vrot.slane %v614_v26, 4 }
 0x250   : > { %v654_v35 = vsel %vm2711_vm5, %v645_v28, %v653_v20  ;;  %v699_v38 = vrot.slane %v697_v10, 4  ;;  %v668_v5 = vrot.slane %v2731_v46, 4  ;;  %v707_v10 = vrot.slane %v628_v14, 6 }
 0x251   : > { %753 = vrot.lane.b32.xlu1 %v2733_v52, %s2467_s25  ;;  %v683_v24 = vmax.bf16 %v654_v35, %v624_v29  ;;  %v618_v39 = vsel %vm2681_vm2, %v616_v37, %v617_v31  ;;  %v676_v40 = vor.u32 %v675_v33, %v672_v32  ;;  %v706_v44 = vrot.slane %v704_v57, 4 }
 0x252   : > { %v626_v41 = vmax.bf16 %v618_v39, %v593_v34  ;;  %v701_v42 = vsel %vm2701_vm4, %v699_v38, %v700_v36 }
 0x253   : > { %741 = vrot.lane.b32.xlu0 %v715_v19, %s2466_s23  ;;  %v714_v26 = vmax.bf16 %v701_v42, %v683_v24  ;;  %v677_v55 = vsel %vm2711_vm5, %v668_v5, %v676_v40  ;;  %v708_v45 = vsel %vm2701_vm4, %v706_v44, %v707_v10 }
 0x254   : > { %v685_v43 = vmax.bf16 %v677_v55, %v626_v41 }
 0x255   : > { %769 = vrot.lane.b32.xlu1 %v2733_v52, %s2468_s12 }
 0x256   : > { %v716_v47 = vmax.bf16 %v708_v45, %v685_v43 }
 0x257   : > { %757 = vrot.lane.b32.xlu0 %v715_v19, %s2467_s25 }
 0x259   : > { %723 = vrot.lane.b32.xlu1 %v714_v26, %s2465_s17 }
 0x25b   : > { %773 = vrot.lane.b32.xlu0 %v715_v19, %s2468_s12 }
 0x25d   : > { %739 = vrot.lane.b32.xlu1 %v714_v26, %s2466_s23 }
 0x25f   : > { %727 = vrot.lane.b32.xlu0 %v716_v47, %s2465_s17 }
 0x261   : > { %755 = vrot.lane.b32.xlu1 %v714_v26, %s2467_s25 }
 0x263   : > { %743 = vrot.lane.b32.xlu0 %v716_v47, %s2466_s23 }
 0x265   : > { %771 = vrot.lane.b32.xlu1 %v714_v26, %s2468_s12 }
 0x267   : > { %759 = vrot.lane.b32.xlu0 %v716_v47, %s2467_s25 }
 0x26b   : > { %775 = vrot.lane.b32.xlu0 %v716_v47, %s2468_s12 }
 0x2bb   : > { %v722_v46 = vpop.permute.xlu1 %721 }
 0x2bc   : > { %v733_v53 = vmax.bf16 %v722_v46, %v2733_v52 }
 0x2bf   : > { %v738_v50 = vpop.permute.xlu1 %737 }
 0x2c0   : > { %v749_v56 = vmax.bf16 %v738_v50, %v733_v53 }
 0x2c1   : > { %v726_v51 = vpop.permute.xlu0 %725 }
 0x2c2   : > { %v735_v59 = vmax.bf16 %v726_v51, %v715_v19 }
 0x2c3   : > { %v754_v54 = vpop.permute.xlu1 %753 }
 0x2c4   : > { %v765_v49 = vmax.bf16 %v754_v54, %v749_v56 }
 0x2c5   : > { %v742_v57 = vpop.permute.xlu0 %741 }
 0x2c6   : > { %v751_v3 = vmax.bf16 %v742_v57, %v735_v59 }
 0x2c7   : > { %v770_v58 = vpop.permute.xlu1 %769 }
 0x2c8   : > { %v2788_v60 = vmax.bf16 %v770_v58, %v765_v49 }
 0x2c9   : > { %v758_v61 = vpop.permute.xlu0 %757 }
 0x2ca   : > { %v1016_v4 = vrot.slane %v2788_v60, 7  ;;  %v767_v7 = vmax.bf16 %v758_v61, %v751_v3  ;;  %v788_v11 = vshrl.u32 %v2788_v60, 16 }
 0x2cb   : > { %v724_v6 = vpop.permute.xlu1 %723 }
 0x2cc   : > { %1026 = vrot.lane.b32.xlu1 %v1016_v4, %s2464_s11  ;;  %v734_v18 = vmax.bf16 %v724_v6, %v714_v26  ;;  %v1017_v30 = vrot.slane %v1016_v4, 4 }
 0x2cd   : > { %v774_v8 = vpop.permute.xlu0 %773 }
 0x2ce   : > { %v2792_v9 = vmax.bf16 %v774_v8, %v767_v7 }
 0x2cf   : > { %v740_v52 = vpop.permute.xlu1 %739 }
 0x2d0   : > { %v787_v12 = vpack.i.b16 %v2792_v9, %v2788_v60  ;;  %v789_v13 = vshrl.u32 %v2792_v9, 16  ;;  %v1021_v14 = vrot.slane %v2792_v9, 7  ;;  %v750_v63 = vmax.bf16 %v740_v52, %v734_v18 }
 0x2d1   : > { %v728_v15 = vpop.permute.xlu0 %727 }
 0x2d2   : > { %v2799_v17 = vpack.i.b16 %v789_v13, %v788_v11  ;;  %1032 = vrot.lane.b32.xlu0 %v1021_v14, %s2464_s11  ;;  %v736_v27 = vmax.bf16 %v728_v15, %v716_v47  ;;  %v1022_v37 = vrot.slane %v1021_v14, 4  ;;  %v804_v22 = vrot.slane %v787_v12, %v2639_v48 }
 0x2d3   : > { %v756_v19 = vpop.permute.xlu1 %755 }
 0x2d4   : > { %v766_v21 = vmax.bf16 %v756_v19, %v750_v63 }
 0x2d5   : > { %v744_v20 = vpop.permute.xlu0 %743 }
 0x2d6   : > { %v752_v31 = vmax.bf16 %v744_v20, %v736_v27 }
 0x2d7   : > { %v772_v23 = vpop.permute.xlu1 %771 }
 0x2d8   : > { %v2802_v29 = vmax.bf16 %v772_v23, %v766_v21 }
 0x2d9   : > { %v760_v28 = vpop.permute.xlu0 %759 }
 0x2da   : > { %v1018_v32 = vrot.slane %v2802_v29, 7  ;;  %v768_v33 = vmax.bf16 %v760_v28, %v752_v31  ;;  %v794_v38 = vshrl.u32 %v2802_v29, 16 }
 0x2dc   : > { %v1019_v34 = vsel %vm2655_vm6, %v1017_v30, %v1018_v32  ;;  %v1020_v24 = vrot.slane %v1018_v32, 4 }
 0x2dd   : > { %v776_v35 = vpop.permute.xlu0 %775  ;;  %1028 = vrot.lane.b32.xlu1 %v1019_v34, %s2464_s11 }
 0x2de   : > { %v2808_v36 = vmax.bf16 %v776_v35, %v768_v33 }
 0x2e0   : > { %v793_v39 = vpack.i.b16 %v2808_v36, %v2802_v29  ;;  %v795_v40 = vshrl.u32 %v2808_v36, 16  ;;  %v1023_v41 = vrot.slane %v2808_v36, 7 }
 0x2e1   : > { %1030 = vrot.lane.b32.xlu1 %v1020_v24, %s2464_s11 }
 0x2e2   : > { %v2816_v42 = vpack.i.b16 %v795_v40, %v794_v38  ;;  %v1024_v5 = vsel %vm2655_vm6, %v1022_v37, %v1023_v41  ;;  %v1025_v26 = vrot.slane %v1023_v41, 4  ;;  %v854_v16 = vrot.slane %v793_v39, %v2639_v48 }
 0x2e3   : > { %1034 = vrot.lane.b32.xlu0 %v1024_v5, %s2464_s11 }
 0x2e4   : > { %v3108_v12 = vrot.slane %v854_v16, %v2645_v1 }
 0x2e7   : > { %1036 = vrot.lane.b32.xlu0 %v1025_v26, %s2464_s11 }
 0x33e   : > { %v1027_v55 = vpop.permute.xlu1 %1026 }
 0x33f   : > { %1044 = vst.msk [vmem:[#allocation2] sm:$0xe] %vm520_vm7, %v1027_v55 }
 0x344   : > { %v1033_v10 = vpop.permute.xlu0 %1032 }
 0x345   : > { %1047 = vst.msk [vmem:[#allocation2 + $0xc] sm:$0xe] %vm520_vm7, %v1033_v10 }
 0x346   : > { %v1050_v43 = vld [vmem:[#allocation2] sm:$0xf] }
 0x347   : > { %v1057_v44 = vshrl.u32 %v1050_v43, 16  ;;  %v1060_v45 = vshll.u32 %v1050_v43, 16  ;;  %v1112_v47 = vld [vmem:[#allocation2] sm:$0xe] }
 0x348   : > { %v1145_v50 = vshrl.u32 %v1112_v47, 16  ;;  %v1148_v56 = vshll.u32 %v1112_v47, 16  ;;  %v1198_v20 = vld [vmem:[#allocation2] sm:$0xc]  ;;  %v2213_v32 = vrot.slane %v1112_v47, 9 }
 0x349   : > { %v1059_v53 = vrot.slane %v1057_v44, 4  ;;  %v1062_v54 = vrot.slane %v1060_v45, 5  ;;  %v2215_v24 = vrot.slane %v1198_v20, 10 }
 0x34a   : > { %v1147_v61 = vrot.slane %v1145_v50, 5  ;;  %v1150_v6 = vrot.slane %v1148_v56, 6 }
 0x34b   : > { %v1063_v4 = vor.u32 %v1062_v54, %v1059_v53 }
 0x34c   : > { %v2825_v51 = vld [vmem:[#allocation2 + $0xc] sm:$0xf]  ;;  %v1151_v63 = vor.u32 %v1150_v6, %v1147_v61 }
 0x34d   : > { %v2827_v57 = vld [vmem:[#allocation2 + $0xc] sm:$0xe]  ;;  %v1081_v58 = vshrl.u32 %v2825_v51, 16  ;;  %v1084_v59 = vshll.u32 %v2825_v51, 16  ;;  %v1064_v19 = vrot.slane %v1063_v4, 4 }
 0x34e   : > { %v1168_v7 = vshrl.u32 %v2827_v57, 16  ;;  %v1171_v8 = vshll.u32 %v2827_v57, 16  ;;  %v1152_v5 = vrot.slane %v1151_v63, 4  ;;  %v2214_v6 = vrot.slane %v2827_v57, 9 }
 0x34f   : > { %v1029_v46 = vpop.permute.xlu1 %1028  ;;  %v1083_v11 = vrot.slane %v1081_v58, 4  ;;  %v1086_v13 = vrot.slane %v1084_v59, 5 }
 0x350   : > { %1045 = vst.msk [vmem:[#allocation2 + $0x4] sm:$0xf] %vm522_vm8, %v1029_v46  ;;  %v1170_v21 = vrot.slane %v1168_v7, 5  ;;  %v1173_v23 = vrot.slane %v1171_v8, 6 }
 0x351   : > { %v1087_v34 = vor.u32 %v1086_v13, %v1083_v11  ;;  %v1199_v13 = vld [vmem:[#allocation2 + $0xc] sm:$0xc] }
 0x352   : > { %v1174_v10 = vor.u32 %v1173_v23, %v1170_v21 }
 0x353   : > { %v1031_v49 = vpop.permute.xlu1 %1030  ;;  %v1088_v53 = vrot.slane %v1087_v34, 4 }
 0x354   : > { %1046 = vst.msk [vmem:[#allocation2 + $0x8] sm:$0x1] %vm524_vm9, %v1031_v49  ;;  %v1175_v21 = vrot.slane %v1174_v10, 4 }
 0x355   : > { %v1035_v3 = vpop.permute.xlu0 %1034 }
 0x356   : > { %1048 = vst.msk [vmem:[#allocation2 + $0x10] sm:$0xf] %vm522_vm8, %v1035_v3 }
 0x357   : > { %v2835_v52 = vld [vmem:[#allocation2 + $0x4] sm:$0xf] }
 0x358   : > { %v1066_v14 = vshll.u32 %v2835_v52, 16  ;;  %v1070_v15 = vshrl.u32 %v2835_v52, 16  ;;  %v1122_v30 = vrot.slane %v2835_v52, 5  ;;  %v1206_v45 = vrot.slane %v2835_v52, 6 }
 0x359   : > { %v1037_v18 = vpop.permute.xlu0 %1036 }
 0x35a   : > { %1049 = vst.msk [vmem:[#allocation2 + $0x14] sm:$0x1] %vm524_vm9, %v1037_v18  ;;  %v1068_v27 = vrot.slane %v1066_v14, 5  ;;  %v1072_v28 = vrot.slane %v1070_v15, 4  ;;  %v1153_v31 = vrot.slane %v1070_v15, 5  ;;  %v1154_v33 = vrot.slane %v1066_v14, 6 }
 0x35b   : > { %v1054_v35 = vld [vmem:[#allocation2 + $0x8] sm:$0x1]  ;;  %v1123_v44 = vsel %vm2681_vm2, %v2213_v32, %v1122_v30  ;;  %v1207_v8 = vsel %vm2701_vm4, %v2215_v24, %v1206_v45 }
 0x35c   : > { %v1069_v37 = vsel %vm2688_vm3, %v1064_v19, %v1068_v27  ;;  %v1073_v38 = vor.u32 %v1072_v28, %v1068_v27  ;;  %v1076_v40 = vshll.u32 %v1054_v35, 16  ;;  %v2843_v26 = vor.u32 %v1154_v33, %v1153_v31  ;;  %v2856_v56 = vld [vmem:[#allocation2 + $0x8] sm:$0x3] }
 0x35d   : > { %v1108_v41 = vmax.bf16 %v1069_v37, %v1050_v43  ;;  %v2845_v55 = vld [vmem:[#allocation2 + $0x10] sm:$0xf]  ;;  %v1159_v14 = vshrl.u32 %v2856_v56, 16  ;;  %v1162_v15 = vshll.u32 %v2856_v56, 16  ;;  %v2216_v31 = vrot.slane %v1199_v13, 10 }
 0x35e   : > { %v1090_v47 = vshll.u32 %v2845_v55, 16  ;;  %v1094_v46 = vshrl.u32 %v2845_v55, 16  ;;  %v1156_v43 = vsel %vm2711_vm5, %v1152_v5, %v2843_v26  ;;  %v1129_v54 = vrot.slane %v2845_v55, 5 }
 0x35f   : > { %v1138_v50 = vmax.bf16 %v1123_v44, %v1108_v41  ;;  %v1074_v59 = vrot.slane %v1073_v38, 4  ;;  %v1078_v61 = vrot.slane %v1076_v40, 5  ;;  %v1213_v23 = vrot.slane %v2845_v55, 6 }
 0x360   : > { %v1092_v49 = vrot.slane %v1090_v47, 5  ;;  %v1176_v58 = vrot.slane %v1094_v46, 5  ;;  %v1096_v4 = vrot.slane %v1094_v46, 4  ;;  %v1177_v7 = vrot.slane %v1090_v47, 6 }
 0x361   : > { %v1194_v3 = vmax.bf16 %v1156_v43, %v1138_v50  ;;  %v1055_v18 = vld [vmem:[#allocation2 + $0x14] sm:$0x1]  ;;  %v1130_v20 = vsel %vm2681_vm2, %v2214_v6, %v1129_v54  ;;  %v1079_v27 = vsel %vm2688_vm3, %v1074_v59, %v1078_v61  ;;  %v1125_v37 = vrot.slane %v1054_v35, 5 }
 0x362   : > { %v1093_v11 = vsel %vm2688_vm3, %v1088_v53, %v1092_v49  ;;  %v1178_v57 = vor.u32 %v1177_v7, %v1176_v58  ;;  %v1097_v32 = vor.u32 %v1096_v4, %v1092_v49  ;;  %v1100_v33 = vshll.u32 %v1055_v18, 16  ;;  %v1143_v34 = vld [vmem:[#allocation2 + $0x14] sm:$0x3] }
 0x363   : > { %v2867_v19 = vmax.bf16 %v1207_v8, %v1194_v3  ;;  %v1110_v63 = vmax.bf16 %v1093_v11, %v2825_v51  ;;  %v1161_v24 = vrot.slane %v1159_v14, 5  ;;  %v1164_v38 = vrot.slane %v1162_v15, 6 }
 0x364   : > { %v1179_v51 = vsel %vm2711_vm5, %v1175_v21, %v1178_v57  ;;  %v1109_v41 = vmax.bf16 %v1079_v27, %v2835_v52  ;;  %v1098_v5 = vrot.slane %v1097_v32, 4  ;;  %v1102_v10 = vrot.slane %v1100_v33, 5 }
 0x365   : > { %1230 = vrot.lane.b32.xlu1 %v2867_v19, %s2465_s17  ;;  %v1140_v28 = vmax.bf16 %v1130_v20, %v1110_v63  ;;  %v1214_v44 = vsel %vm2701_vm4, %v2216_v31, %v1213_v23  ;;  %v1124_v47 = vrot.slane %v1122_v30, 4  ;;  %v1182_v46 = vshrl.u32 %v1143_v34, 16 }
 0x366   : > { %v1185_v50 = vshll.u32 %v1143_v34, 16  ;;  %v1165_v53 = vor.u32 %v1164_v38, %v1161_v24  ;;  %v1103_v49 = vsel %vm2688_vm3, %v1098_v5, %v1102_v10  ;;  %v1157_v59 = vrot.slane %v2843_v26, 4 }
 0x367   : > { %v1196_v40 = vmax.bf16 %v1179_v51, %v1140_v28  ;;  %v1126_v35 = vsel %vm2681_vm2, %v1124_v47, %v1125_v37  ;;  %v1132_v61 = vrot.slane %v1055_v18, 5  ;;  %v1184_v30 = vrot.slane %v1182_v46, 5 }
 0x368   : > { %v1139_v58 = vmax.bf16 %v1126_v35, %v1109_v41  ;;  %v1187_v3 = vrot.slane %v1185_v50, 6  ;;  %v1111_v4 = vmax.bf16 %v1103_v49, %v2845_v55  ;;  %v1166_v6 = vsel %vm2711_vm5, %v1157_v59, %v1165_v53 }
 0x369   : > { %v1224_v43 = vmax.bf16 %v1214_v44, %v1196_v40  ;;  %1246 = vrot.lane.b32.xlu1 %v2867_v19, %s2466_s23  ;;  %v1209_v7 = vrot.slane %v2856_v56, 6  ;;  %v1131_v8 = vrot.slane %v1129_v54, 4  ;;  %v1208_v26 = vrot.slane %v1206_v45, 4 }
 0x36a   : > { %v1195_v11 = vmax.bf16 %v1166_v6, %v1139_v58  ;;  %v1188_v14 = vor.u32 %v1187_v3, %v1184_v30  ;;  %v1180_v18 = vrot.slane %v1178_v57, 4  ;;  %v1216_v52 = vrot.slane %v1143_v34, 6 }
 0x36b   : > { %1234 = vrot.lane.b32.xlu0 %v1224_v43, %s2465_s17  ;;  %v1133_v13 = vsel %vm2681_vm2, %v1131_v8, %v1132_v61  ;;  %v1210_v15 = vsel %vm2701_vm4, %v1208_v26, %v1209_v7  ;;  %v1215_v63 = vrot.slane %v1213_v23, 4  ;;  %v2934_v6 = vrot.slane %v2799_v17, %v2639_v48 }
 0x36c   : > { %v1141_v55 = vmax.bf16 %v1133_v13, %v1111_v4  ;;  %v1223_v54 = vmax.bf16 %v1210_v15, %v1195_v11  ;;  %v1189_v56 = vsel %vm2711_vm5, %v1180_v18, %v1188_v14 }
 0x36d   : > { %1262 = vrot.lane.b32.xlu1 %v2867_v19, %s2467_s25  ;;  %v1217_v20 = vsel %vm2701_vm4, %v1215_v63, %v1216_v52 }
 0x36e   : > { %v1197_v45 = vmax.bf16 %v1189_v56, %v1141_v55  ;;  %v2941_v55 = vrot.slane %v2934_v6, %v2645_v1 }
 0x36f   : > { %1250 = vrot.lane.b32.xlu0 %v1224_v43, %s2466_s23 }
 0x370   : > { %v1225_v21 = vmax.bf16 %v1217_v20, %v1197_v45  ;;  %v2198_v63 = vcombine.low %v2941_v55, %v2941_v55 }
 0x371   : > { %1278 = vrot.lane.b32.xlu1 %v2867_v19, %s2468_s12 }
 0x373   : > { %1266 = vrot.lane.b32.xlu0 %v1224_v43, %s2467_s25 }
 0x375   : > { %1232 = vrot.lane.b32.xlu1 %v1223_v54, %s2465_s17 }
 0x377   : > { %1282 = vrot.lane.b32.xlu0 %v1224_v43, %s2468_s12 }
 0x379   : > { %1248 = vrot.lane.b32.xlu1 %v1223_v54, %s2466_s23 }
 0x37b   : > { %1236 = vrot.lane.b32.xlu0 %v1225_v21, %s2465_s17 }
 0x37d   : > { %1264 = vrot.lane.b32.xlu1 %v1223_v54, %s2467_s25 }
 0x37f   : > { %1252 = vrot.lane.b32.xlu0 %v1225_v21, %s2466_s23 }
 0x381   : > { %1280 = vrot.lane.b32.xlu1 %v1223_v54, %s2468_s12 }
 0x383   : > { %1268 = vrot.lane.b32.xlu0 %v1225_v21, %s2467_s25 }
 0x387   : > { %1284 = vrot.lane.b32.xlu0 %v1225_v21, %s2468_s12 }
 0x3d7   : > { %v1231_v57 = vpop.permute.xlu1 %1230 }
 0x3d8   : > { %v1242_v28 = vmax.bf16 %v1231_v57, %v2867_v19 }
 0x3db   : > { %v1247_v23 = vpop.permute.xlu1 %1246 }
 0x3dc   : > { %v1258_v32 = vmax.bf16 %v1247_v23, %v1242_v28  ;;  %v2965_v28 = vrot.slane %v2816_v42, %v2639_v48 }
 0x3dd   : > { %v1235_v27 = vpop.permute.xlu0 %1234 }
 0x3de   : > { %v1244_v37 = vmax.bf16 %v1235_v27, %v1224_v43 }
 0x3df   : > { %v1263_v31 = vpop.permute.xlu1 %1262 }
 0x3e0   : > { %v1274_v34 = vmax.bf16 %v1263_v31, %v1258_v32 }
 0x3e1   : > { %v1251_v33 = vpop.permute.xlu0 %1250 }
 0x3e2   : > { %v1260_v40 = vmax.bf16 %v1251_v33, %v1244_v37 }
 0x3e3   : > { %v1279_v51 = vpop.permute.xlu1 %1278 }
 0x3e4   : > { %v2920_v24 = vmax.bf16 %v1279_v51, %v1274_v34  ;;  %v2975_v51 = vrot.slane %v2965_v28, %v2645_v1 }
 0x3e5   : > { %v1267_v38 = vpop.permute.xlu0 %1266 }
 0x3e6   : > { %v1518_v41 = vrot.slane %v2920_v24, 7  ;;  %v1276_v10 = vmax.bf16 %v1267_v38, %v1260_v40  ;;  %v1297_v59 = vshrl.u32 %v2920_v24, 16  ;;  %v2205_v25 = vcombine.low %v2975_v51, %v2975_v51 }
 0x3e7   : > { %v1233_v5 = vpop.permute.xlu1 %1232 }
 0x3e8   : > { %1528 = vrot.lane.b32.xlu1 %v1518_v41, %s2464_s11  ;;  %v1243_v35 = vmax.bf16 %v1233_v5, %v1223_v54  ;;  %v1519_v26 = vrot.slane %v1518_v41, 4 }
 0x3e9   : > { %v1283_v44 = vpop.permute.xlu0 %1282 }
 0x3ea   : > { %v2924_v47 = vmax.bf16 %v1283_v44, %v1276_v10 }
 0x3eb   : > { %v1249_v19 = vpop.permute.xlu1 %1248 }
 0x3ec   : > { %v1296_v46 = vpack.i.b16 %v2924_v47, %v2920_v24  ;;  %v1523_v50 = vrot.slane %v2924_v47, 7  ;;  %v1298_v53 = vshrl.u32 %v2924_v47, 16  ;;  %v1259_v58 = vmax.bf16 %v1249_v19, %v1243_v35 }
 0x3ed   : > { %v1237_v43 = vpop.permute.xlu0 %1236  ;;  %v2266_v24 = vcombine.high %v3108_v12, %v3108_v12  ;;  %v805_v47 = vcombine.high %v804_v22, %v2453_v0 }
 0x3ee   : > { %1534 = vrot.lane.b32.xlu1 %v1523_v50, %s2464_s11  ;;  %v1299_v3 = vpack.i.b16 %v1298_v53, %v1297_v59  ;;  %v1245_v7 = vmax.bf16 %v1237_v43, %v1225_v21  ;;  %v1524_v45 = vrot.slane %v1523_v50, 4 }
 0x3ef   : > { %v1265_v49 = vpop.permute.xlu1 %1264 }
 0x3f0   : > { %v1275_v30 = vmax.bf16 %v1265_v49, %v1259_v58  ;;  %v2944_v15 = vrot.slane %v1299_v3, %v2639_v48 }
 0x3f1   : > { %v1253_v61 = vpop.permute.xlu0 %1252 }
 0x3f2   : > { %v1261_v13 = vmax.bf16 %v1253_v61, %v1245_v7  ;;  %v2956_v20 = vrot.slane %v2944_v15, %v2645_v1 }
 0x3f3   : > { %v1281_v4 = vpop.permute.xlu1 %1280 }
 0x3f4   : > { %v2936_v8 = vmax.bf16 %v1281_v4, %v1275_v30  ;;  %v2217_v33 = vcombine.low %v2956_v20, %v2956_v20 }
 0x3f5   : > { %v1269_v11 = vpop.permute.xlu0 %1268 }
 0x3f6   : > { %v1520_v14 = vrot.slane %v2936_v8, 7  ;;  %v1277_v18 = vmax.bf16 %v1269_v11, %v1261_v13  ;;  %v1303_v21 = vshrl.u32 %v2936_v8, 16 }
 0x3f8   : > { %v1521_v17 = vsel %vm2655_vm6, %v1519_v26, %v1520_v14  ;;  %v1522_v54 = vrot.slane %v1520_v14, 4 }
 0x3f9   : > { %v1285_v56 = vpop.permute.xlu0 %1284  ;;  %1530 = vrot.lane.b32.xlu0 %v1521_v17, %s2464_s11 }
 0x3fa   : > { %v2949_v52 = vmax.bf16 %v1285_v56, %v1277_v18  ;;  %1532 = vrot.lane.b32.xlu1 %v1522_v54, %s2464_s11 }
 0x3fc   : > { %v1302_v57 = vpack.i.b16 %v2949_v52, %v2936_v8  ;;  %v1304_v23 = vshrl.u32 %v2949_v52, 16  ;;  %v1525_v27 = vrot.slane %v2949_v52, 7  ;;  %v819_v52 = vrot.slane %v805_v47, %v2645_v1 }
 0x3fe   : > { %v1305_v31 = vpack.i.b16 %v1304_v23, %v1303_v21  ;;  %v1526_v32 = vsel %vm2655_vm6, %v1524_v45, %v1525_v27  ;;  %900 = vrot.lane.b32.xlu1 %v2198_v63, %s2460_s10  ;;  %v1527_v34 = vrot.slane %v1525_v27, 4  ;;  %v1363_v60 = vrot.slane %v1302_v57, %v2639_v48 }
 0x3ff   : > { %1536 = vrot.lane.b32.xlu0 %v1526_v32, %s2464_s11  ;;  %v2271_v57 = vcombine.high %v2956_v20, %v2956_v20  ;;  %vm971_vm6 = vcmask 261120  }
 0x400   : > { %v2978_v37 = vrot.slane %v1305_v31, %v2639_v48  ;;  %v3116_v36 = vrot.slane %v1363_v60, %v2645_v1 }
 0x402   : > { %1409 = vrot.lane.b32.xlu1 %v2217_v33, %s2460_s10  ;;  %v2986_v42 = vrot.slane %v2978_v37, %v2645_v1  ;;  %v2274_v8 = vcombine.high %v3116_v36, %v3116_v36 }
 0x403   : > { %1538 = vrot.lane.b32.xlu0 %v1527_v34, %s2464_s11 }
 0x404   : > { %v2224_v38 = vcombine.low %v2986_v42, %v2986_v42 }
 0x407   : > { %935 = vrot.lane.b32.xlu0 %v2205_v25, %s2460_s10 }
 0x40b   : > { %1444 = vrot.lane.b32.xlu0 %v2224_v38, %s2460_s10 }
 0x45a   : > { %v1529_v40 = vpop.permute.xlu1 %1528 }
 0x45b   : > { %1546 = vst.msk [vmem:[#allocation2] sm:$0xe] %vm520_vm7, %v1529_v40 }
 0x460   : > { %v1535_v41 = vpop.permute.xlu1 %1534 }
 0x461   : > { %1549 = vst.msk [vmem:[#allocation2 + $0xc] sm:$0xe] %vm520_vm7, %v1535_v41  ;;  %vm974_vm7 = vcmask 392192  }
 0x462   : > { %v1552_v5 = vld [vmem:[#allocation2] sm:$0xf] }
 0x463   : > { %v1614_v10 = vld [vmem:[#allocation2] sm:$0xe]  ;;  %v1559_v44 = vshrl.u32 %v1552_v5, 16  ;;  %v1562_v19 = vshll.u32 %v1552_v5, 16 }
 0x464   : > { %v1647_v50 = vshrl.u32 %v1614_v10, 16  ;;  %v1650_v43 = vshll.u32 %v1614_v10, 16  ;;  %v1700_v13 = vld [vmem:[#allocation2] sm:$0xc]  ;;  %v2232_v17 = vrot.slane %v1614_v10, 9 }
 0x465   : > { %v1561_v49 = vrot.slane %v1559_v44, 4  ;;  %v1564_v58 = vrot.slane %v1562_v19, 5  ;;  %v2234_v23 = vrot.slane %v1700_v13, 10 }
 0x466   : > { %v1649_v61 = vrot.slane %v1647_v50, 5  ;;  %v1652_v30 = vrot.slane %v1650_v43, 6 }
 0x467   : > { %v1565_v7 = vor.u32 %v1564_v58, %v1561_v49 }
 0x468   : > { %v2995_v59 = vld [vmem:[#allocation2 + $0xc] sm:$0xf]  ;;  %v1653_v26 = vor.u32 %v1652_v30, %v1649_v61 }
 0x469   : > { %v1583_v3 = vshrl.u32 %v2995_v59, 16  ;;  %v1586_v4 = vshll.u32 %v2995_v59, 16  ;;  %v3001_v14 = vld [vmem:[#allocation2 + $0xc] sm:$0xe]  ;;  %v1566_v45 = vrot.slane %v1565_v7, 4 }
 0x46a   : > { %v1654_v33 = vrot.slane %v1653_v26, 4  ;;  %v1670_v25 = vshrl.u32 %v3001_v14, 16  ;;  %v1673_v38 = vshll.u32 %v3001_v14, 16 }
 0x46b   : > { %v1531_v35 = vpop.permute.xlu0 %1530  ;;  %v1585_v54 = vrot.slane %v1583_v3, 4  ;;  %v1588_v56 = vrot.slane %v1586_v4, 5 }
 0x46c   : > { %1547 = vst.msk [vmem:[#allocation2 + $0x4] sm:$0xf] %vm522_vm8, %v1531_v35  ;;  %v1533_v53 = vpop.permute.xlu1 %1532 }
 0x46d   : > { %1548 = vst.msk [vmem:[#allocation2 + $0x8] sm:$0x1] %vm524_vm9, %v1533_v53  ;;  %v1589_v35 = vor.u32 %v1588_v56, %v1585_v54 }
 0x471   : > { %v1537_v11 = vpop.permute.xlu0 %1536 }
 0x472   : > { %1550 = vst.msk [vmem:[#allocation2 + $0x10] sm:$0xf] %vm522_vm8, %v1537_v11  ;;  %vm977_vm8 = vcmask 523264  }
 0x473   : > { %v1553_v18 = vld [vmem:[#allocation2 + $0x4] sm:$0xf] }
 0x474   : > { %v1568_v63 = vshll.u32 %v1553_v18, 16  ;;  %v1572_v21 = vshrl.u32 %v1553_v18, 16  ;;  %v1556_v27 = vld [vmem:[#allocation2 + $0x8] sm:$0x1]  ;;  %v1624_v32 = vrot.slane %v1553_v18, 5  ;;  %v1708_v50 = vrot.slane %v1553_v18, 6 }
 0x475   : > { %v1539_v31 = vpop.permute.xlu0 %1538  ;;  %v1644_v34 = vld [vmem:[#allocation2 + $0x8] sm:$0x3]  ;;  %v1578_v44 = vshll.u32 %v1556_v27, 16  ;;  %v1627_v43 = vrot.slane %v1556_v27, 5 }
 0x476   : > { %1551 = vst.msk [vmem:[#allocation2 + $0x14] sm:$0x1] %vm524_vm9, %v1539_v31  ;;  %v1570_v40 = vrot.slane %v1568_v63, 5  ;;  %v1574_v41 = vrot.slane %v1572_v21, 4  ;;  %v1655_v10 = vrot.slane %v1572_v21, 5  ;;  %v1656_v19 = vrot.slane %v1568_v63, 6 }
 0x477   : > { %v1661_v58 = vshrl.u32 %v1644_v34, 16  ;;  %v1664_v61 = vshll.u32 %v1644_v34, 16  ;;  %v1625_v3 = vsel %vm2681_vm2, %v2232_v17, %v1624_v32  ;;  %v1626_v7 = vrot.slane %v1624_v32, 4 }
 0x478   : > { %v1571_v53 = vsel %vm2688_vm3, %v1566_v45, %v1570_v40  ;;  %v1575_v49 = vor.u32 %v1574_v41, %v1570_v40  ;;  %v1657_v4 = vor.u32 %v1656_v19, %v1655_v10  ;;  %v1580_v13 = vrot.slane %v1578_v44, 5 }
 0x479   : > { %v1610_v30 = vmax.bf16 %v1571_v53, %v1552_v5  ;;  %v3010_v11 = vld [vmem:[#allocation2 + $0x10] sm:$0xf]  ;;  %v1663_v63 = vrot.slane %v1661_v58, 5  ;;  %v1666_v21 = vrot.slane %v1664_v61, 6  ;;  %v1590_v45 = vrot.slane %v1589_v35, 4 }
 0x47a   : > { %v1576_v26 = vrot.slane %v1575_v49, 4  ;;  %v1658_v54 = vsel %vm2711_vm5, %v1654_v33, %v1657_v4  ;;  %v1659_v56 = vrot.slane %v1657_v4, 4  ;;  %v1592_v17 = vshll.u32 %v3010_v11, 16 }
 0x47b   : > { %v1640_v27 = vmax.bf16 %v1625_v3, %v1610_v30  ;;  %v1667_v31 = vor.u32 %v1666_v21, %v1663_v63  ;;  %v1596_v32 = vshrl.u32 %v3010_v11, 16  ;;  %v1709_v41 = vsel %vm2701_vm4, %v2234_v23, %v1708_v50 }
 0x47c   : > { %v1581_v5 = vsel %vm2688_vm3, %v1576_v26, %v1580_v13  ;;  %v1628_v44 = vsel %vm2681_vm2, %v1626_v7, %v1627_v43  ;;  %v1710_v19 = vrot.slane %v1708_v50, 4  ;;  %v1711_v33 = vrot.slane %v1644_v34, 6 }
 0x47d   : > { %v1696_v40 = vmax.bf16 %v1658_v54, %v1640_v27  ;;  %v1611_v10 = vmax.bf16 %v1581_v5, %v1553_v18  ;;  %v1594_v53 = vrot.slane %v1592_v17, 5  ;;  %v1598_v35 = vrot.slane %v1596_v32, 4  ;;  %v1557_v49 = vld [vmem:[#allocation2 + $0x14] sm:$0x1] }
 0x47e   : > { %v1672_v30 = vrot.slane %v1670_v25, 5  ;;  %v1668_v3 = vsel %vm2711_vm5, %v1659_v56, %v1667_v31  ;;  %v1675_v23 = vrot.slane %v1673_v38, 6  ;;  %v1645_v26 = vld [vmem:[#allocation2 + $0x14] sm:$0x3]  ;;  %v2233_v50 = vrot.slane %v3001_v14, 9 }
 0x47f   : > { %v3022_v58 = vmax.bf16 %v1709_v41, %v1696_v40  ;;  %v1641_v61 = vmax.bf16 %v1628_v44, %v1611_v10  ;;  %v1595_v4 = vsel %vm2688_vm3, %v1590_v45, %v1594_v53  ;;  %v1599_v18 = vor.u32 %v1598_v35, %v1594_v53 }
 0x480   : > { %v1631_v43 = vrot.slane %v3010_v11, 5  ;;  %v1602_v7 = vshll.u32 %v1557_v49, 16  ;;  %v1712_v25 = vsel %vm2701_vm4, %v1710_v19, %v1711_v33  ;;  %v1678_v13 = vrot.slane %v1596_v32, 5  ;;  %v1701_v33 = vld [vmem:[#allocation2 + $0xc] sm:$0xc] }
 0x481   : > { %1732 = vrot.lane.b32.xlu1 %v3022_v58, %s2465_s17  ;;  %v1697_v34 = vmax.bf16 %v1668_v3, %v1641_v61  ;;  %v1679_v63 = vrot.slane %v1592_v17, 6  ;;  %v1600_v21 = vrot.slane %v1599_v18, 4  ;;  %v1612_v38 = vmax.bf16 %v1595_v4, %v2995_v59 }
 0x482   : > { %v1604_v54 = vrot.slane %v1602_v7, 5  ;;  %v1684_v56 = vshrl.u32 %v1645_v26, 16  ;;  %v1676_v45 = vor.u32 %v1675_v23, %v1672_v30  ;;  %v1687_v5 = vshll.u32 %v1645_v26, 16 }
 0x483   : > { %v3034_v27 = vmax.bf16 %v1712_v25, %v1697_v34  ;;  %v1632_v14 = vsel %vm2681_vm2, %v2233_v50, %v1631_v43  ;;  %v1680_v17 = vor.u32 %v1679_v63, %v1678_v13  ;;  %v1634_v32 = vrot.slane %v1557_v49, 5 }
 0x484   : > { %v1605_v31 = vsel %vm2688_vm3, %v1600_v21, %v1604_v54  ;;  %v1686_v40 = vrot.slane %v1684_v56, 5  ;;  %v1689_v59 = vrot.slane %v1687_v5, 6  ;;  %v1642_v41 = vmax.bf16 %v1632_v14, %v1612_v38 }
 0x485   : > { %1748 = vrot.lane.b32.xlu1 %v3022_v58, %s2466_s23  ;;  %1734 = vrot.lane.b32.xlu0 %v3034_v27, %s2465_s17  ;;  %v1613_v10 = vmax.bf16 %v1605_v31, %v3010_v11  ;;  %v1677_v44 = vrot.slane %v1676_v45, 4  ;;  %v1633_v19 = vrot.slane %v1631_v43, 4  ;;  %v1715_v53 = vrot.slane %v3010_v11, 6 }
 0x486   : > { %v1690_v49 = vor.u32 %v1689_v59, %v1686_v40  ;;  %v2235_v3 = vrot.slane %v1701_v33, 10  ;;  %v1682_v4 = vrot.slane %v1680_v17, 4  ;;  %v1718_v18 = vrot.slane %v1645_v26, 6 }
 0x487   : > { %v1681_v2 = vsel %vm2711_vm5, %v1677_v44, %v1680_v17  ;;  %v1635_v35 = vsel %vm2681_vm2, %v1633_v19, %v1634_v32  ;;  %v1717_v50 = vrot.slane %v1715_v53, 4  ;;  %v1313_v26 = vrot.slane %v1296_v46, %v2639_v48 }
 0x488   : > { %v1698_v61 = vmax.bf16 %v1681_v2, %v1642_v41  ;;  %v1643_v30 = vmax.bf16 %v1635_v35, %v1613_v10  ;;  %v1716_v23 = vsel %vm2701_vm4, %v2235_v3, %v1715_v53  ;;  %v1691_v11 = vsel %vm2711_vm5, %v1682_v4, %v1690_v49  ;;  %v3177_v3 = vpop.permute.xlu0 %935 }
 0x489   : > { %1764 = vrot.lane.b32.xlu1 %v3022_v58, %s2467_s25  ;;  %1750 = vrot.lane.b32.xlu0 %v3034_v27, %s2466_s23  ;;  %v1719_v43 = vsel %vm2701_vm4, %v1717_v50, %v1718_v18  ;;  %v3094_v25 = vrot.slane %v804_v22, %v2645_v1  ;;  %v3105_v9 = vrot.slane %v1313_v26, %v2645_v1  ;;  %vm980_vm9 = vcmask 654336  }
 0x48a   : > { %v3063_v62 = vmax.bf16 %v1716_v23, %v1698_v61  ;;  %v1699_v34 = vmax.bf16 %v1691_v11, %v1643_v30  ;;  %v2263_v46 = vcombine.high %v2941_v55, %v2941_v55  ;;  %v2267_v13 = vcombine.high %v2975_v51, %v2975_v51  ;;  %v3175_v30 = vpop.permute.xlu1 %900 }
 0x48b   : > { %v2262_v29 = vcombine.high %v3094_v25, %v3094_v25  ;;  %v2270_v39 = vcombine.high %v3105_v9, %v3105_v9  ;;  %v1314_v63 = vcombine.high %v1313_v26, %v2453_v0  ;;  %v855_v21 = vcombine.high %v854_v16, %v2453_v0 }
 0x48c   : > { %v3071_v7 = vmax.bf16 %v1719_v43, %v1699_v34  ;;  %v2201_v55 = vcombine.low %v819_v52, %v819_v52  ;;  %v830_v38 = vcombine.high %v2934_v6, %v2453_v0  ;;  %v2275_v54 = vcombine.high %v2986_v42, %v2986_v42  ;;  %v3181_v23 = vpop.permute.xlu0 %1444 }
 0x48d   : > { %1780 = vrot.lane.b32.xlu1 %v3022_v58, %s2468_s12  ;;  %1766 = vrot.lane.b32.xlu0 %v3034_v27, %s2467_s25  ;;  %v1328_v20 = vrot.slane %v1314_v63, %v2645_v1  ;;  %v869_v56 = vrot.slane %v855_v21, %v2645_v1  ;;  %v1364_v51 = vcombine.high %v1363_v60, %v2453_v0 }
 0x48e   : > { %v880_v45 = vcombine.high %v2965_v28, %v2453_v0  ;;  %v844_v5 = vrot.slane %v830_v38, %v2645_v1  ;;  %v1339_v6 = vcombine.high %v2944_v15, %v2453_v0  ;;  %v1389_v32 = vcombine.high %v2978_v37, %v2453_v0  ;;  %v3179_v4 = vpop.permute.xlu1 %1409 }
 0x48f   : > { %v2220_v14 = vcombine.low %v1328_v20, %v1328_v20  ;;  %v2208_v42 = vcombine.low %v869_v56, %v869_v56  ;;  %v1378_v31 = vrot.slane %v1364_v51, %v2645_v1  ;;  %v2264_v44 = vcombine.high %v819_v52, %v819_v52 }
 0x490   : > { %v2202_v17 = vcombine.low %v844_v5, %v844_v5  ;;  %v1353_v28 = vrot.slane %v1339_v6, %v2645_v1  ;;  %v894_v59 = vrot.slane %v880_v45, %v2645_v1  ;;  %v1403_v10 = vrot.slane %v1389_v32, %v2645_v1 }
 0x491   : > { %1736 = vrot.lane.b32.xlu1 %v3063_v62, %s2465_s17  ;;  %1782 = vrot.lane.b32.xlu0 %v3034_v27, %s2468_s12  ;;  %v2227_v40 = vcombine.low %v1378_v31, %v1378_v31  ;;  %v2272_v37 = vcombine.high %v1328_v20, %v1328_v20  ;;  %v2268_v33 = vcombine.high %v869_v56, %v869_v56 }
 0x492   : > { %v2221_v15 = vcombine.low %v1353_v28, %v1353_v28  ;;  %v2209_v41 = vcombine.low %v894_v59, %v894_v59  ;;  %v2228_v19 = vcombine.low %v1403_v10, %v1403_v10  ;;  %v2265_v2 = vcombine.high %v844_v5, %v844_v5 }
 0x493   : > { %v2276_v53 = vcombine.high %v1378_v31, %v1378_v31  ;;  %v2273_v35 = vcombine.high %v1353_v28, %v1353_v28  ;;  %v2269_v49 = vcombine.high %v894_v59, %v894_v59  ;;  %v2277_v61 = vcombine.high %v1403_v10, %v1403_v10 }
 0x495   : > { %1752 = vrot.lane.b32.xlu1 %v3063_v62, %s2466_s23  ;;  %1738 = vrot.lane.b32.xlu0 %v3071_v7, %s2465_s17  ;;  %s2094_s17 = scalar_lea.sflag [#allocation6], %s2605_s13 }
 0x499   : > { %1768 = vrot.lane.b32.xlu1 %v3063_v62, %s2467_s25  ;;  %1754 = vrot.lane.b32.xlu0 %v3071_v7, %s2466_s23 }
 0x49d   : > { %1784 = vrot.lane.b32.xlu1 %v3063_v62, %s2468_s12  ;;  %1770 = vrot.lane.b32.xlu0 %v3071_v7, %s2467_s25 }
 0x4a1   : > { %905 = vrot.lane.b32.xlu1 %v2262_v29, %s2459_s9  ;;  %1786 = vrot.lane.b32.xlu0 %v3071_v7, %s2468_s12 }
 0x4a5   : > { %1414 = vrot.lane.b32.xlu1 %v2270_v39, %s2459_s9  ;;  %940 = vrot.lane.b32.xlu0 %v2266_v24, %s2459_s9 }
 0x4a9   : > { %910 = vrot.lane.b32.xlu1 %v2263_v46, %s2458_s7  ;;  %1449 = vrot.lane.b32.xlu0 %v2274_v8, %s2459_s9 }
 0x4ad   : > { %1419 = vrot.lane.b32.xlu1 %v2271_v57, %s2458_s7  ;;  %945 = vrot.lane.b32.xlu0 %v2267_v13, %s2458_s7 }
 0x4b1   : > { %915 = vrot.lane.b32.xlu1 %v2201_v55, %s2457_s8  ;;  %1454 = vrot.lane.b32.xlu0 %v2275_v54, %s2458_s7 }
 0x4b5   : > { %1424 = vrot.lane.b32.xlu1 %v2220_v14, %s2457_s8  ;;  %950 = vrot.lane.b32.xlu0 %v2208_v42, %s2457_s8 }
 0x4b9   : > { %920 = vrot.lane.b32.xlu1 %v2202_v17, %s2456_s28  ;;  %1459 = vrot.lane.b32.xlu0 %v2227_v40, %s2457_s8 }
 0x4bd   : > { %1429 = vrot.lane.b32.xlu1 %v2221_v15, %s2456_s28  ;;  %955 = vrot.lane.b32.xlu0 %v2209_v41, %s2456_s28 }
 0x4c1   : > { %925 = vrot.lane.b32.xlu1 %v2264_v44, %s2454_s16  ;;  %1464 = vrot.lane.b32.xlu0 %v2228_v19, %s2456_s28 }
 0x4c5   : > { %1434 = vrot.lane.b32.xlu1 %v2272_v37, %s2454_s16  ;;  %960 = vrot.lane.b32.xlu0 %v2268_v33, %s2454_s16 }
 0x4c9   : > { %930 = vrot.lane.b32.xlu1 %v2265_v2, %s2455_s26  ;;  %1469 = vrot.lane.b32.xlu0 %v2276_v53, %s2454_s16 }
 0x4cd   : > { %1439 = vrot.lane.b32.xlu1 %v2273_v35, %s2455_s26  ;;  %965 = vrot.lane.b32.xlu0 %v2269_v49, %s2455_s26 }
 0x4d1   : > { %1474 = vrot.lane.b32.xlu0 %v2277_v61, %s2455_s26 }
 0x4f3   : > { %v1733_v11 = vpop.permute.xlu1 %1732 }
 0x4f4   : > { %v1744_v24 = vmax.bf16 %v1733_v11, %v3022_v58 }
 0x4f7   : > { %v1735_v18 = vpop.permute.xlu0 %1734  ;;  %v1749_v34 = vpop.permute.xlu1 %1748 }
 0x4f8   : > { %v1760_v47 = vmax.bf16 %v1749_v34, %v1744_v24  ;;  %v1745_v63 = vmax.bf16 %v1735_v18, %v3034_v27 }
 0x4fb   : > { %v1751_v50 = vpop.permute.xlu0 %1750  ;;  %v1765_v43 = vpop.permute.xlu1 %1764 }
 0x4fc   : > { %v1776_v57 = vmax.bf16 %v1765_v43, %v1760_v47  ;;  %v1761_v54 = vmax.bf16 %v1751_v50, %v1745_v63 }
 0x4ff   : > { %v1767_v22 = vpop.permute.xlu0 %1766  ;;  %v1781_v16 = vpop.permute.xlu1 %1780 }
 0x500   : > { %v1792_v21 = vmax.bf16 %v1781_v16, %v1776_v57  ;;  %v1777_v5 = vmax.bf16 %v1767_v22, %v1761_v54 }
 0x502   : > { %v1799_v58 = vshrl.u32 %v1792_v21, 16 }
 0x503   : > { %v1783_v26 = vpop.permute.xlu0 %1782  ;;  %v1737_v60 = vpop.permute.xlu1 %1736 }
 0x504   : > { %v1746_v46 = vmax.bf16 %v1737_v60, %v3063_v62  ;;  %v1793_v42 = vmax.bf16 %v1783_v26, %v1777_v5 }
 0x506   : > { %v1805_v15 = vshrl.u32 %v1793_v42, 16 }
 0x507   : > { %v1739_v29 = vpop.permute.xlu0 %1738  ;;  %v1753_v39 = vpop.permute.xlu1 %1752 }
 0x508   : > { %v1762_v13 = vmax.bf16 %v1753_v39, %v1746_v46  ;;  %v1747_v55 = vmax.bf16 %v1739_v29, %v3071_v7 }
 0x50b   : > { %v1755_v8 = vpop.permute.xlu0 %1754  ;;  %v1769_v52 = vpop.permute.xlu1 %1768 }
 0x50c   : > { %v1778_v38 = vmax.bf16 %v1769_v52, %v1762_v13  ;;  %v1763_v51 = vmax.bf16 %v1755_v8, %v1747_v55 }
 0x50f   : > { %v1771_v20 = vpop.permute.xlu0 %1770  ;;  %v1785_v56 = vpop.permute.xlu1 %1784 }
 0x510   : > { %v1794_v45 = vmax.bf16 %v1785_v56, %v1778_v38  ;;  %v1779_v6 = vmax.bf16 %v1771_v20, %v1763_v51 }
 0x512   : > { %v1798_v14 = vpack.i.b16 %v1794_v45, %v1792_v21  ;;  %v1800_v62 = vshrl.u32 %v1794_v45, 16 }
 0x513   : > { %v1787_v31 = vpop.permute.xlu0 %1786  ;;  %v3187_v17 = vpop.permute.xlu1 %905 }
 0x514   : > { %v1801_v32 = vpack.i.b16 %v1800_v62, %v1799_v58  ;;  %v1815_v27 = vrot.slane %v1798_v14, %v2639_v48  ;;  %v1795_v40 = vmax.bf16 %v1787_v31, %v1779_v6  ;;  %v970_v31 = vsel %vm967_vm0, %v3094_v25, %v3175_v30  ;;  %v2018_v25 = vld [vmem:[%s3354_s4] sm:$0xff] }
 0x516   : > { %v3191_v7 = vrot.slane %v1815_v27, %v2645_v1  ;;  %v1840_v28 = vrot.slane %v1801_v32, %v2639_v48  ;;  %v1804_v59 = vpack.i.b16 %v1795_v40, %v1793_v42  ;;  %v1806_v41 = vshrl.u32 %v1795_v40, 16 }
 0x517   : > { %v3194_v10 = vpop.permute.xlu0 %940  ;;  %v3196_v44 = vpop.permute.xlu1 %1414  ;;  %v1816_v18 = vcombine.high %v1815_v27, %v2453_v0  ;;  %v991_v32 = vsel %vm967_vm0, %v3108_v12, %v3177_v3  ;;  %v973_v27 = vsel %vm971_vm6, %v970_v31, %v3187_v17  ;;  %v1478_v3 = vsel %vm967_vm0, %v3105_v9, %v3179_v4 }
 0x518   : > { %v1865_v19 = vrot.slane %v1804_v59, %v2639_v48  ;;  %v1848_v37 = vrot.slane %v1840_v28, %v2645_v1  ;;  %v1807_v33 = vpack.i.b16 %v1806_v41, %v1805_v15  ;;  %v2278_v2 = vcombine.high %v3191_v7, %v3191_v7 }
 0x519   : > { %v1830_v26 = vrot.slane %v1816_v18, %v2645_v1  ;;  %v1841_v46 = vcombine.high %v1840_v28, %v2453_v0  ;;  %v993_v40 = vsel %vm971_vm6, %v991_v32, %v3194_v10  ;;  %v1493_v17 = vsel %vm967_vm0, %v3116_v36, %v3181_v23 }
 0x51a   : > { %v3203_v53 = vrot.slane %v1865_v19, %v2645_v1  ;;  %v1890_v35 = vrot.slane %v1807_v33, %v2639_v48  ;;  %1916 = vrot.lane.b32.xlu1 %v2278_v2, %s2459_s9  ;;  %v2236_v50 = vcombine.low %v1848_v37, %v1848_v37  ;;  %v1866_v48 = vcombine.high %v1865_v19, %v2453_v0 }
 0x51b   : > { %v3207_v49 = vpop.permute.xlu0 %1449  ;;  %v911_v61 = vpop.permute.xlu1 %910  ;;  %v2279_v60 = vcombine.high %v1848_v37, %v1848_v37  ;;  %v2239_v8 = vcombine.low %v1830_v26, %v1830_v26  ;;  %v2280_v21 = vcombine.high %v1830_v26, %v1830_v26  ;;  %v1855_v55 = vrot.slane %v1841_v46, %v2645_v1 }
 0x51c   : > { %v2282_v11 = vcombine.high %v3203_v53, %v3203_v53  ;;  %v1898_v34 = vrot.slane %v1890_v35, %v2645_v1  ;;  %v1880_v24 = vrot.slane %v1866_v48, %v2645_v1  ;;  %v1891_v13 = vcombine.high %v1890_v35, %v2453_v0 }
 0x51d   : > { %v2240_v51 = vcombine.low %v1855_v55, %v1855_v55  ;;  %v2281_v58 = vcombine.high %v1855_v55, %v1855_v55  ;;  %v976_v15 = vsel %vm974_vm7, %v973_v27, %v911_v61  ;;  %v1480_v37 = vsel %vm971_vm6, %v1478_v3, %v3196_v44 }
 0x51e   : > { %1951 = vrot.lane.b32.xlu0 %v2282_v11, %s2459_s9  ;;  %1911 = vrot.lane.b32.xlu1 %v2236_v50, %s2460_s10  ;;  %v2243_v16 = vcombine.low %v1898_v34, %v1898_v34  ;;  %v2283_v47 = vcombine.high %v1898_v34, %v1898_v34  ;;  %v2246_v63 = vcombine.low %v1880_v24, %v1880_v24 }
 0x51f   : > { %v946_v43 = vpop.permute.xlu0 %945  ;;  %v3215_v22 = vpop.permute.xlu1 %1419  ;;  %v2284_v20 = vcombine.high %v1880_v24, %v1880_v24  ;;  %v1905_v56 = vrot.slane %v1891_v13, %v2645_v1  ;;  %v1495_v33 = vsel %vm971_vm6, %v1493_v17, %v3207_v49 }
 0x520   : > { %v995_v41 = vsel %vm974_vm7, %v993_v40, %v946_v43  ;;  %v1482_v9 = vsel %vm974_vm7, %v1480_v37, %v3215_v22 }
 0x521   : > { %v2247_v5 = vcombine.low %v1905_v56, %v1905_v56  ;;  %v2285_v62 = vcombine.high %v1905_v56, %v1905_v56 }
 0x522   : > { %1946 = vrot.lane.b32.xlu0 %v2243_v16, %s2460_s10  ;;  %1921 = vrot.lane.b32.xlu1 %v2279_v60, %s2458_s7 }
 0x523   : > { %v3221_v29 = vpop.permute.xlu0 %1454  ;;  %v916_v39 = vpop.permute.xlu1 %915 }
 0x524   : > { %v979_v12 = vsel %vm977_vm8, %v976_v15, %v916_v39  ;;  %v1497_v36 = vsel %vm974_vm7, %v1495_v33, %v3221_v29 }
 0x526   : > { %1956 = vrot.lane.b32.xlu0 %v2283_v47, %s2458_s7  ;;  %1926 = vrot.lane.b32.xlu1 %v2239_v8, %s2457_s8 }
 0x527   : > { %v951_v52 = vpop.permute.xlu0 %950  ;;  %v1425_v57 = vpop.permute.xlu1 %1424 }
 0x528   : > { %v997_v30 = vsel %vm977_vm8, %v995_v41, %v951_v52  ;;  %v1484_v44 = vsel %vm977_vm8, %v1482_v9, %v1425_v57 }
 0x52a   : > { %1961 = vrot.lane.b32.xlu0 %v2246_v63, %s2457_s8  ;;  %1936 = vrot.lane.b32.xlu1 %v2280_v21, %s2454_s16 }
 0x52b   : > { %v1460_v38 = vpop.permute.xlu0 %1459  ;;  %v921_v54 = vpop.permute.xlu1 %920 }
 0x52c   : > { %v982_v10 = vsel %vm980_vm9, %v979_v12, %v921_v54  ;;  %v1499_v11 = vsel %vm977_vm8, %v1497_v36, %v1460_v38 }
 0x52e   : > { %1971 = vrot.lane.b32.xlu0 %v2284_v20, %s2454_s16  ;;  %1931 = vrot.lane.b32.xlu1 %v2240_v51, %s2456_s28 }
 0x52f   : > { %v956_v45 = vpop.permute.xlu0 %955  ;;  %v1430_v0 = vpop.permute.xlu1 %1429 }
 0x530   : > { %v999_v19 = vsel %vm980_vm9, %v997_v30, %v956_v45  ;;  %v1486_v34 = vsel %vm980_vm9, %v1484_v44, %v1430_v0 }
 0x532   : > { %1966 = vrot.lane.b32.xlu0 %v2247_v5, %s2456_s28  ;;  %1941 = vrot.lane.b32.xlu1 %v2281_v58, %s2455_s26  ;;  %s2286_s28 = sshll.u32 %s2521_s22, 8  ;;  %s2469_s22 = smov [#allocation7]  }
 0x533   : > { %v1465_v6 = vpop.permute.xlu0 %1464  ;;  %v926_v14 = vpop.permute.xlu1 %925  ;;  %s3306_s11 = scalar_lea.hbm %s3355_s5, %s2286_s28  ;;  %s2388_s25 = sshll.u32 %s2469_s22, 4  ;;  %s2389_s25 = int_to_ptr.vmem [resolvable:$false] %s2388_s25 }
 0x534   : > { %v985_v2 = vsel %vm983_vm10, %v982_v10, %v926_v14  ;;  %v1501_v50 = vsel %vm980_vm9, %v1499_v11, %v1465_v6  ;;  %s2390_s12 = scalar_lea.vmem %s2389_s25, 512 }
 0x536   : > { %1976 = vrot.lane.b32.xlu0 %v2285_v62, %s2455_s26  ;;  %2021 = vperm.xlu1 %2350, %v2018_v25   ;;  %v2016_v25 = vld [vmem:[%s3353_s3] sm:$0xf]  ;;  %s2186_s26 = sshll.u32 %s2605_s13, 4 }
 0x537   : > { %v961_v1 = vpop.permute.xlu0 %960  ;;  %v1435_v42 = vpop.permute.xlu1 %1434  ;;  %s240_s8 = scalar_lea.vmem [#allocation7], %s2186_s26 }
 0x538   : > { %v1001_v35 = vsel %vm983_vm10, %v999_v19, %v961_v1  ;;  %v1488_v43 = vsel %vm983_vm10, %v1486_v34, %v1435_v42  ;;  %s2108_s7 = sshll.u32 %s240_s8, 4  ;;  %s3308_s7 = int_to_ptr.vmem [resolvable:$true] %s2108_s7 }
 0x539   : > { %s2384_s23 = scalar_lea.vmem %s3308_s7, 256  ;;  %p2391_p7 = scmp.lt.s32.totalorder %s3308_s7, %s2389_s25 }
 0x53a   : > { %p2385_p6 = scmp.ne.s32.totalorder %s3308_s7, %s2384_s23  ;;  %p2392_p10 = scmp.lt.s32.totalorder %s2390_s12, %s2384_s23 }
 0x53b   : > { %v1470_v28 = vpop.permute.xlu0 %1469  ;;  %v931_v59 = vpop.permute.xlu1 %930 }
 0x53c   : > { %v988_v4 = vsel %vm986_vm11, %v985_v2, %v931_v59  ;;  %v1503_v22 = vsel %vm983_vm10, %v1501_v50, %v1470_v28  ;;  %p2386_p12 = pnand %p2385_p6, %p3374_p11  ;;  %p2393_p2 = por %p2392_p10, %p2391_p7 }
 0x53e   : > { %p2387_p13 = pneg %p2386_p12 }
 0x53f   : > { %v966_v61 = vpop.permute.xlu0 %965  ;;  %v1440_v18 = vpop.permute.xlu1 %1439 }
 0x540   : > { %v1003_v23 = vsel %vm986_vm11, %v1001_v35, %v966_v61  ;;  %v1490_v26 = vsel %vm986_vm11, %v1488_v43, %v1440_v18  ;;  %p2394_p4 = pnand %p2393_p2, %p2387_p13 }
 0x541   : > { %v2212_v49 = vcombine.low %v988_v4, %v1003_v23 }
 0x543   : > { %v1009_v48 = vrot.slane %v2212_v49, 7  ;;  %v1475_v16 = vpop.permute.xlu0 %1474 }
 0x544   : > { %v1505_v60 = vsel %vm986_vm11, %v1503_v22, %v1475_v16 }
 0x545   : > { %1011 = vst [vmem:[#allocation3] sm:$0x22] %v1009_v48  ;;  %v2231_v29 = vcombine.low %v1490_v26, %v1505_v60 }
 0x547   : > { %v1511_v39 = vrot.slane %v2231_v29, 6 }
 0x549   : > { %1513 = vst [vmem:[#allocation3] sm:$0x44] %v1511_v39 }
 0x58c   : > { %v1917_v24 = vpop.permute.xlu1 %1916 }
 0x590   : > { %v1952_v47 = vpop.permute.xlu0 %1951  ;;  %v1912_v46 = vpop.permute.xlu1 %1911 }
 0x591   : > { %v1980_v55 = vsel %vm967_vm0, %v3191_v7, %v1912_v46 }
 0x592   : > { %v1982_v56 = vsel %vm971_vm6, %v1980_v55, %v1917_v24 }
 0x594   : > { %v1947_v8 = vpop.permute.xlu0 %1946  ;;  %v1922_v52 = vpop.permute.xlu1 %1921 }
 0x595   : > { %v1995_v38 = vsel %vm967_vm0, %v3203_v53, %v1947_v8  ;;  %v1984_v45 = vsel %vm974_vm7, %v1982_v56, %v1922_v52 }
 0x596   : > { %v1997_v51 = vsel %vm971_vm6, %v1995_v38, %v1952_v47 }
 0x598   : > { %v1957_v57 = vpop.permute.xlu0 %1956  ;;  %v1927_v13 = vpop.permute.xlu1 %1926 }
 0x599   : > { %v1999_v0 = vsel %vm974_vm7, %v1997_v51, %v1957_v57  ;;  %v1986_v5 = vsel %vm977_vm8, %v1984_v45, %v1927_v13 }
 0x59c   : > { %v1962_v63 = vpop.permute.xlu0 %1961  ;;  %v1937_v21 = vpop.permute.xlu1 %1936 }
 0x59d   : > { %v2001_v58 = vsel %vm977_vm8, %v1999_v0, %v1962_v63 }
 0x5a0   : > { %v1972_v54 = vpop.permute.xlu0 %1971  ;;  %v1932_v20 = vpop.permute.xlu1 %1931 }
 0x5a1   : > { %v1988_v7 = vsel %vm980_vm9, %v1986_v5, %v1932_v20 }
 0x5a2   : > { %v1990_v62 = vsel %vm983_vm10, %v1988_v7, %v1937_v21 }
 0x5a4   : > { %v1967_v6 = vpop.permute.xlu0 %1966  ;;  %v1942_v53 = vpop.permute.xlu1 %1941 }
 0x5a5   : > { %v2003_v14 = vsel %vm980_vm9, %v2001_v58, %v1967_v6  ;;  %v1992_v31 = vsel %vm986_vm11, %v1990_v62, %v1942_v53 }
 0x5a6   : > { %v2005_v1 = vsel %vm983_vm10, %v2003_v14, %v1972_v54 }
 0x5a8   : > { %v1977_v42 = vpop.permute.xlu0 %1976 }
 0x5a9   : > { %v2007_v32 = vsel %vm986_vm11, %v2005_v1, %v1977_v42 }
 0x5aa   : > { %v2250_v27 = vcombine.low %v1992_v31, %v2007_v32 }
 0x5ac   : > { %v2013_v40 = vrot.slane %v2250_v27, 5 }
 0x5ae   : > { %2015 = vst [vmem:[#allocation3] sm:$0x88] %v2013_v40 }
 0x5b5   : > { %v2017_v28 = vld [vmem:[#allocation3] sm:$0xff]  ;;  %v2022_v12 = vpop.permute.xlu1 %2021 }
 0x5b6   : > { %v2252_v59 = vcombine.high %v2017_v28, %v2017_v28  ;;  %v2251_v15 = vcombine.low %v2017_v28, %v2017_v28 }
 0x5b8   : > { %2253 = vmatprep.subr.msk.bf16.mxu1 %vm2033_vm12, %v2252_v59  ;;  %v2035_v41 = vsel %vm2033_vm12, %v2251_v15, 0 }
 0x5b9   : > { %2041 = vmatpush1.bf16.msra.mxu1 %v2035_v41 }
 0x5bc   : > { %2254 = vmatmul.mubr.msk.bf16.vlgmr.msra.gmra.mrb[0].mxu1 %vm2029_vm13, %v2016_v25 }
 0x68f   : > { %v2074_v30 = vpop.f32.mrb[0].mxu1 }
 0x690   : > { %v2075_v3 = vadd.f32 %v2074_v30, %v2022_v12  ;;  %v2076_v17 = vpop.f32.mrb[1].mxu1 }
 0x691   : > { %v2077_v10 = vadd.f32 %v2076_v17, %v2022_v12  ;;  %v2078_v19 = vpop.f32.mrb[2].mxu1 }
 0x692   : > { %v2081_v37 = vadd.f32 3.0, %v2075_v3  ;;  %v2079_v33 = vpop.f32.mrb[3].mxu1 }
 0x693   : > { %v2082_v2 = vadd.f32 3.0, %v2077_v10 }
 0x694   : > { %v2083_v35 = vmax.f32 %v2081_v37, 0.0 }
 0x695   : > { %v2084_v61 = vmax.f32 %v2082_v2, 0.0 }
 0x696   : > { %v2085_v9 = vmin.f32 %v2083_v35, 6.0 }
 0x697   : > { %v2086_v36 = vmin.f32 %v2084_v61, 6.0 }
 0x698   : > { %v2087_v4 = vmul.f32 %v2085_v9, %v2075_v3 }
 0x699   : > { %v2088_v23 = vmul.f32 %v2086_v36, %v2077_v10 }
 0x69a   : > { %v2089_v44 = vmul.f32 0.16666667, %v2087_v4 }
 0x69b   : > { %v2090_v11 = vmul.f32 0.16666667, %v2088_v23 }
 0x69c   : > { %2091 = vst [vmem:[%s240_s8] sm:$0xff] %v2089_v44 }
 0x69d   : > { %2092 = vst [vmem:[%s240_s8 + $0x8] sm:$0xff] %v2090_v11 }
 0x69e   : > { %2397 = shalt.err (!%p2394_p4)
}
 0x69f   : > { %s2398_s13 = scalar_lea.hbm %s3306_s11, 256  ;;  %s2402_s15 = scalar_lea.hbm %s3355_s5, 512 }
 0x6a0   : > { %p2399_p5 = scmp.ne.s32.totalorder %s3306_s11, %s2398_s13  ;;  %p2403_p0 = scmp.lt.u32.totalorder %s3306_s11, %s3355_s5 }
 0x6a1   : > { %p2404_p1 = scmp.lt.u32.totalorder %s2402_s15, %s2398_s13  ;;  %p2406_p6 = scmp.lt.u32.totalorder %s2398_s13, %s3306_s11 }
 0x6a2   : > { %p2400_p8 = pnand %p2399_p5, %p3374_p11 }
 0x6a3   : > { %p2405_p3 = por %p2404_p1, %p2403_p0 }
 0x6a4   : > { %p2401_p9 = pneg %p2400_p8 }
 0x6a5   : > { %p2407_p12 = por %p2406_p6, %p2405_p3 }
 0x6a7   : > { %p2408_p13 = pnand %p2407_p12, %p2401_p9 }
 0x6a9   : > { %2411 = shalt.err (!%p2408_p13)
}
 0x6aa   : > { %2289 = dma.vmem_to_hbm [thread:$0]  (%p3374_p11), %s3308_s7, 256, %s3306_s11, %s2094_s17  }
 0x6ab PF: > { %s2120_s28 = sand.u32 1, %s2438_s18   ;;  %p3375_p7 = scmp.ne.s32.totalorder %s3360_s6, 0 }
 0x6ac   : > { %p3376_p10 = scmp.ge.s32.totalorder %s2450_s21, 2  ;;  %s2121_s8 = scalar_lea.sflag [#allocation6], %s2120_s28 }
 0x6ae   : > { %p2296_p2 = pnand %p3376_p10, %p3375_p7 }
 0x6b0   : > { %2433 = dma.done.wait (!%p2296_p2), %s2121_s8, 256  }
 0x6b1   : > { %2435 = vsyncadd (!%p2296_p2), %s2121_s8, 4294967040  ;;  %p18_p4 = scmp.ge.s32.totalorder %s2525_s24, 4   ;;  %s3377_s18 = smov %s2442_s19 }
 0x6b2   : > { %s3378_s19 = smov %s2446_s20  ;;  %s3379_s20 = smov %s2537_s27 }
 0x6b3   : > { %s3380_s21 = smov %s2525_s24  ;;  %20 = sbr.rel (!%p18_p4) target bundleno = 5 (0x5), region = 85 }
 0x6ba   :  { %2126 = vsyncpa [#allocation5], 1 }
 0x6bb   :  { %2128 = vsyncpa [#allocation5 + $0x1], 1 }
 0x6bc   :  { %2129 = vsyncpa [#allocation6], 1 }
 0x6bd   :  { %2131 = vsyncpa [#allocation6 + $0x1], 1 }

</bundles_post_ra>
